<compile_context>
chip_gen: v6e
topology: v6e:2x2x1
jax: 0.10.0
libtpu: 0.0.40
codegen_flags: <defaults>
</compile_context>

<pallas_src>
import jax
import jax.numpy as jnp
from jax.experimental import pallas as pl
from jax.experimental.pallas import tpu as pltpu

_LANE = 128     # lane width: last tile dim should be a multiple of this
_SUBLANE = 8    # sublane width: second-to-last tile dim multiple


def _round_up(n, m):
    return ((n + m - 1) // m) * m


def _cdiv(a, b):
    return (a + b - 1) // b


def _pad_to(a, shape):
    pads = [(0, t - s) for s, t in zip(a.shape, shape)]
    if all(p == (0, 0) for p in pads):
        return a
    return jnp.pad(a, pads)


def _single_buffer_supported():
    """Probe whether pl.BlockSpec accepts pipeline_mode=pl.Buffered(1)."""
    if not hasattr(pl, "Buffered"):
        return False
    try:
        pl.BlockSpec((_SUBLANE, _LANE), lambda i: (0, 0),
                     pipeline_mode=pl.Buffered(1))
        return True
    except (TypeError, ValueError):
        return False


_SB_OK = _single_buffer_supported()


def _spec(shape, index_map, *, single_buffer=False):
    """BlockSpec; constant-index operands may request single buffering."""
    if single_buffer:
        try:
            return pl.BlockSpec(shape, index_map, pipeline_mode=pl.Buffered(1))
        except (TypeError, ValueError):
            pass
    return pl.BlockSpec(shape, index_map)


def _vmem_capacity_bytes():
    """Per-core VMEM capacity; conservative 64 MiB (v7x) if unknown."""
    try:
        info = pltpu.get_tpu_info()
        cap = getattr(info, "vmem_capacity_bytes", None)
        if cap:
            return int(cap)
    except Exception:
        pass
    return 64 << 20


def _make_kernel(has_res_blocks, weights_resident):
    """Grid = (batch_tiles, num_res_blocks). h_ref carries activations."""

    def _prologue(x_ref, w_in_ref, b_in_ref, w1_ref, b1_ref, h_ref, cdtype):
        # linear_input + ReLU + linear1   (x is already cast to cdtype)
        h = jnp.dot(x_ref[...], w_in_ref[...],
                    preferred_element_type=jnp.float32)
        h = jnp.maximum(h + b_in_ref[...], 0.0)
        h = jnp.dot(h.astype(cdtype), w1_ref[...],
                    preferred_element_type=jnp.float32)
        h_ref[...] = h + b1_ref[...]

    def _epilogue(w_out_ref, b_out_ref, h_ref, o_ref, cdtype):
        # post-res ReLU + linear_output
        h = jnp.maximum(h_ref[...], 0.0)
        out = jnp.dot(h.astype(cdtype), w_out_ref[...],
                      preferred_element_type=jnp.float32)
        o_ref[...] = (out + b_out_ref[...]).astype(o_ref.dtype)

    if has_res_blocks:
        def kernel(x_ref, w_in_ref, b_in_ref, w1_ref, b1_ref,
                   wb1_ref, bb1_ref, wb2_ref, bb2_ref,
                   w_out_ref, b_out_ref, o_ref, h_ref):
            r = pl.program_id(1)
            cdtype = w1_ref.dtype  # MXU input dtype; accumulation is f32.

            @pl.when(r == 0)
            def _():
                _prologue(x_ref, w_in_ref, b_in_ref, w1_ref, b1_ref,
                          h_ref, cdtype)

            # One residual block per inner grid step.  Resident stacks are
            # indexed by r; streamed stacks present a single block (index 0).
            w_idx = r if weights_resident else 0
            t = jnp.maximum(h_ref[...], 0.0)
            t = jnp.dot(t.astype(cdtype), wb1_ref[w_idx],
                        preferred_element_type=jnp.float32)
            t = jnp.maximum(t + bb1_ref[r], 0.0)
            t = jnp.dot(t.astype(cdtype), wb2_ref[w_idx],
                        preferred_element_type=jnp.float32)
            # Re-read h_ref for the residual (short live range under the MXU).
            h_ref[...] = (t + bb2_ref[r]) + h_ref[...]

            @pl.when(r == pl.num_programs(1) - 1)
            def _():
                _epilogue(w_out_ref, b_out_ref, h_ref, o_ref, cdtype)
    else:
        def kernel(x_ref, w_in_ref, b_in_ref, w1_ref, b1_ref,
                   w_out_ref, b_out_ref, o_ref, h_ref):
            cdtype = w1_ref.dtype
            _prologue(x_ref, w_in_ref, b_in_ref, w1_ref, b1_ref, h_ref, cdtype)
            _epilogue(w_out_ref, b_out_ref, h_ref, o_ref, cdtype)

    return kernel


def dense_resnet_forward(x, params, num_res_blocks, *, batch_tile=256):
    """x: (batch, in_features) float32.  params: see init_params."""
    batch, in_features = x.shape
    width = params["w1"].shape[0]
    out_features = params["w_out"].shape[1]
    w_dtype = params["w1"].dtype
    w_item = jnp.dtype(w_dtype).itemsize
    has_res_blocks = num_res_blocks > 0

    # ---- padded feature dims (lane width) ----
    in_p = _round_up(in_features, _LANE)
    wid_p = _round_up(width, _LANE)
    out_p = _round_up(out_features, _LANE)

    # ---- generation-aware VMEM budget ----
    vmem_cap = _vmem_capacity_bytes()
    hard_cap = int(0.85 * vmem_cap)
    cbuf = 1 if _SB_OK else 2  # buffer count of constant-index operands

    # ---- resident vs. streamed res-block weight stacks ----
    res_stack_bytes = num_res_blocks * 2 * wid_p * wid_p * w_item
    weights_resident = has_res_blocks and (
        cbuf * res_stack_bytes <= min(32 << 20, hard_cap // 2))

    # ---- batch tiling ----
    tb_req = batch_tile
    if has_res_blocks and not weights_resident:
        # Streamed weights: raise the batch tile to amortize the per-tile
        # HBM re-stream (v6e/v7x roofline crossover is far above tb=256).
        tb_req = max(tb_req, 1024)
    tb = _round_up(min(tb_req, _round_up(batch, _SUBLANE)), _SUBLANE)
    batch_p = _round_up(batch, tb)
    if batch_p // tb < 2:
        # Try to expose >= 2 batch tiles so the "parallel" axis can span both
        # TensorCores on v7x megacore (nearly free with resident weights).
        tb_half = _round_up(_cdiv(batch, 2), _SUBLANE)
        if _SUBLANE <= tb_half < tb:
            tb = tb_half
            batch_p = _round_up(batch, tb)
    n_bt = batch_p // tb

    # ---- pad + cast operands (x pre-cast to the MXU input dtype) ----
    x_p = _pad_to(x.astype(w_dtype), (batch_p, in_p))
    w_in = _pad_to(params["w_in"], (in_p, wid_p))
    b_in = _pad_to(params["b_in"], (1, wid_p))
    w1 = _pad_to(params["w1"], (wid_p, wid_p))
    b1 = _pad_to(params["b1"], (1, wid_p))
    w_out = _pad_to(params["w_out"], (wid_p, out_p))
    b_out = _pad_to(params["b_out"], (1, out_p))

    inputs = [x_p, w_in, b_in, w1, b1]
    if has_res_blocks:
        wb1 = _pad_to(params["wb1"], (num_res_blocks, wid_p, wid_p))
        bb1 = _pad_to(params["bb1"], (num_res_blocks, 1, wid_p))
        wb2 = _pad_to(params["wb2"], (num_res_blocks, wid_p, wid_p))
        bb2 = _pad_to(params["bb2"], (num_res_blocks, 1, wid_p))
        inputs += [wb1, bb1, wb2, bb2]
    inputs += [w_out, b_out]

    nrb_grid = max(num_res_blocks, 1)
    grid = (n_bt, nrb_grid)
    kernel = _make_kernel(has_res_blocks, weights_resident)
    x_item = jnp.dtype(w_dtype).itemsize

    def _footprint(sb):
        c = 1 if sb else 2
        fp = (2 * tb * in_p * x_item                           # x (2-buf)
              + 2 * tb * out_p * 4                             # out (2-buf)
              + c * (in_p + wid_p + out_p) * wid_p * w_item    # fixed weights
              + c * (3 + 2 * num_res_blocks) * wid_p * 4       # biases
              + tb * wid_p * 4)                                # h scratch
        if has_res_blocks:
            if weights_resident:
                fp += c * res_stack_bytes
            else:
                fp += 2 * 2 * wid_p * wid_p * w_item           # streamed 2-buf
        return fp

    def _build_specs(sb):
        def rep2(shape):       # constant-index 2-D operand
            return _spec(shape, lambda b, r: (0, 0), single_buffer=sb)

        in_specs = [
            pl.BlockSpec((tb, in_p), lambda b, r: (b, 0)),     # x (batch-tiled)
            rep2((in_p, wid_p)), rep2((1, wid_p)),             # w_in, b_in
            rep2((wid_p, wid_p)), rep2((1, wid_p)),            # w1, b1
        ]
        if has_res_blocks:
            if weights_resident:
                def wspec():   # full-R stack, resident in VMEM
                    return _spec((num_res_blocks, wid_p, wid_p),
                                 lambda b, r: (0, 0, 0), single_buffer=sb)
            else:
                def wspec():   # one block per inner grid step, streamed
                    return pl.BlockSpec((1, wid_p, wid_p),
                                        lambda b, r: (r, 0, 0))

            def bspec():       # biases always fully resident (tiny)
                return _spec((num_res_blocks, 1, wid_p),
                             lambda b, r: (0, 0, 0), single_buffer=sb)

            in_specs += [wspec(), bspec(), wspec(), bspec()]
        in_specs += [rep2((wid_p, out_p)), rep2((1, out_p))]   # w_out, b_out
        out_specs = pl.BlockSpec((tb, out_p), lambda b, r: (b, 0))
        return in_specs, out_specs

    def _call(sb):
        in_specs, out_specs = _build_specs(sb)
        vmem_limit = int(min(hard_cap,
                             max(32 << 20, int(1.25 * _footprint(sb)))))
        return pl.pallas_call(
            kernel,
            out_shape=jax.ShapeDtypeStruct((batch_p, out_p), jnp.float32),
            grid_spec=pltpu.PrefetchScalarGridSpec(
                num_scalar_prefetch=0,
                grid=grid,
                in_specs=in_specs,
                out_specs=out_specs,
                scratch_shapes=[pltpu.VMEM((tb, wid_p), jnp.float32)],
            ),
            compiler_params=pltpu.CompilerParams(
                dimension_semantics=("parallel", "arbitrary"),
                vmem_limit_bytes=vmem_limit,
            ),
        )(*inputs)

    if _SB_OK:
        try:
            out_padded = _call(True)
        except Exception:
            # pipeline_mode accepted at construction but rejected at lowering:
            # retry with default double buffering.
            out_padded = _call(False)
    else:
        out_padded = _call(False)

    return out_padded[:batch, :out_features]


def init_params(key, in_features, out_features, num_res_blocks, width,
                weight_dtype=jnp.bfloat16):
    """Deterministic synthetic init.  Weights stored (in, out) for x @ W.

    Weights are bf16 (MXU-native on all TPU generations); biases stay f32.
    """
    ks = jax.random.split(key, 10)
    scale = 0.1

    def w(k, shape, dtype):
        return (scale * jax.random.normal(k, shape)).astype(dtype)

    return {
        "w_in": w(ks[0], (in_features, width), weight_dtype),
        "b_in": w(ks[1], (1, width), jnp.float32),
        "w1": w(ks[2], (width, width), weight_dtype),
        "b1": w(ks[3], (1, width), jnp.float32),
        "wb1": w(ks[4], (num_res_blocks, width, width), weight_dtype),
        "bb1": w(ks[5], (num_res_blocks, 1, width), jnp.float32),
        "wb2": w(ks[6], (num_res_blocks, width, width), weight_dtype),
        "bb2": w(ks[7], (num_res_blocks, 1, width), jnp.float32),
        "w_out": w(ks[8], (width, out_features), weight_dtype),
        "b_out": w(ks[9], (1, out_features), jnp.float32),
    }


def dense_resnet_reference(x, params, num_res_blocks):
    """Pure-JAX reference mirroring the PyTorch forward (same bf16/f32 mix)."""
    cdtype = params["w1"].dtype

    def dense(h, w, b):
        return jnp.dot(h.astype(cdtype), w,
                       preferred_element_type=jnp.float32) + b

    h = dense(x, params["w_in"], params["b_in"])
    h = jnp.maximum(h, 0.0)
    h = dense(h, params["w1"], params["b1"])
    for i in range(num_res_blocks):
        res = h
        t = jnp.maximum(h, 0.0)
        t = dense(t, params["wb1"][i], params["bb1"][i])
        t = jnp.maximum(t, 0.0)
        t = dense(t, params["wb2"][i], params["bb2"][i])
        h = t + res
    h = jnp.maximum(h, 0.0)
    return dense(h, params["w_out"], params["b_out"])


if __name__ == "__main__":
    batch = 8
    in_features = 16
    out_features = 8
    num_res_blocks = 2
    width = 32

    key = jax.random.PRNGKey(0)
    kx, kp = jax.random.split(key)
    x = jax.random.normal(kx, (batch, in_features), dtype=jnp.float32)
    params = init_params(kp, in_features, out_features, num_res_blocks, width)

    out = dense_resnet_forward(x, params, num_res_blocks)
    out = jax.block_until_ready(out)

    ref = dense_resnet_reference(x, params, num_res_blocks)
    assert out.shape == (batch, out_features)
    # bf16 MXU inputs with f32 accumulation -> bf16-level tolerance.
    assert jnp.allclose(out, ref, atol=1e-2, rtol=1e-2), \
        float(jnp.max(jnp.abs(out - ref)))

    # Also exercise the static num_res_blocks == 0 path.
    params0 = init_params(kp, in_features, out_features, 0, width)
    out0 = jax.block_until_ready(dense_resnet_forward(x, params0, 0))
    ref0 = dense_resnet_reference(x, params0, 0)
    assert out0.shape == (batch, out_features)
    assert jnp.allclose(out0, ref0, atol=1e-2, rtol=1e-2), \
        float(jnp.max(jnp.abs(out0 - ref0)))

    print("KERNEL_OK")
</pallas_src>

<mosaic_0001>
module attributes {stable_mosaic.version = 11 : i64} {
  func.func @kernel(%arg0: i32, %arg1: i32, %arg2: memref<8x128xbf16, #tpu.memory_space<vmem>>, %arg3: memref<128x128xbf16, #tpu.memory_space<vmem>>, %arg4: memref<1x128xf32, #tpu.memory_space<vmem>>, %arg5: memref<128x128xbf16, #tpu.memory_space<vmem>>, %arg6: memref<1x128xf32, #tpu.memory_space<vmem>>, %arg7: memref<2x128x128xbf16, #tpu.memory_space<vmem>>, %arg8: memref<2x1x128xf32, #tpu.memory_space<vmem>>, %arg9: memref<2x128x128xbf16, #tpu.memory_space<vmem>>, %arg10: memref<2x1x128xf32, #tpu.memory_space<vmem>>, %arg11: memref<128x128xbf16, #tpu.memory_space<vmem>>, %arg12: memref<1x128xf32, #tpu.memory_space<vmem>>, %arg13: memref<8x128xf32, #tpu.memory_space<vmem>>, %arg14: memref<8x128xf32, #tpu.memory_space<vmem>>) attributes {dimension_semantics = [#tpu.dimension_semantics<parallel>, #tpu.dimension_semantics<arbitrary>], iteration_bounds = array<i64: 1, 2>, scalar_prefetch = 0 : i64, scratch_operands = 1 : i64, tpu.core_type = #tpu.core_type<tc>, window_params = [{transform_indices = @transform_0, window_bounds = array<i64: 8, 128>}, {pipeline_mode = #tpu.pipeline_mode<synchronous>, transform_indices = @transform_1, window_bounds = array<i64: 128, 128>}, {pipeline_mode = #tpu.pipeline_mode<synchronous>, transform_indices = @transform_2, window_bounds = array<i64: 1, 128>}, {pipeline_mode = #tpu.pipeline_mode<synchronous>, transform_indices = @transform_3, window_bounds = array<i64: 128, 128>}, {pipeline_mode = #tpu.pipeline_mode<synchronous>, transform_indices = @transform_4, window_bounds = array<i64: 1, 128>}, {pipeline_mode = #tpu.pipeline_mode<synchronous>, transform_indices = @transform_5, window_bounds = array<i64: 2, 128, 128>}, {pipeline_mode = #tpu.pipeline_mode<synchronous>, transform_indices = @transform_6, window_bounds = array<i64: 2, 1, 128>}, {pipeline_mode = #tpu.pipeline_mode<synchronous>, transform_indices = @transform_7, window_bounds = array<i64: 2, 128, 128>}, {pipeline_mode = #tpu.pipeline_mode<synchronous>, transform_indices = @transform_8, window_bounds = array<i64: 2, 1, 128>}, {pipeline_mode = #tpu.pipeline_mode<synchronous>, transform_indices = @transform_9, window_bounds = array<i64: 128, 128>}, {pipeline_mode = #tpu.pipeline_mode<synchronous>, transform_indices = @transform_10, window_bounds = array<i64: 1, 128>}, {transform_indices = @transform_11, window_bounds = array<i64: 8, 128>}]} {
    %c0_i32 = arith.constant 0 : i32
    %0 = arith.cmpi eq, %arg1, %c0_i32 : i32
    %1 = arith.extui %0 : i1 to i32
    %c0_i32_0 = arith.constant 0 : i32
    %2 = arith.cmpi ne, %1, %c0_i32_0 : i32
    scf.if %2 {
      %c0_18 = arith.constant 0 : index
      %c0_19 = arith.constant 0 : index
      %34 = vector.load %arg2[%c0_18, %c0_19] : memref<8x128xbf16, #tpu.memory_space<vmem>>, vector<8x128xbf16>
      %c0_20 = arith.constant 0 : index
      %c0_21 = arith.constant 0 : index
      %35 = vector.load %arg3[%c0_20, %c0_21] : memref<128x128xbf16, #tpu.memory_space<vmem>>, vector<128x128xbf16>
      %cst_22 = arith.constant dense<0.000000e+00> : vector<8x128xf32>
      %36 = tpu.matmul %34, %35, %cst_22 {dimension_numbers = #tpu.dot_dimension_numbers<[1], [0], [0], [1], [0, 0, 1, 1], [], []>} : vector<8x128xbf16>, vector<128x128xbf16>, vector<8x128xf32> -> vector<8x128xf32>
      %c0_23 = arith.constant 0 : index
      %c0_24 = arith.constant 0 : index
      %37 = vector.load %arg4[%c0_23, %c0_24] : memref<1x128xf32, #tpu.memory_space<vmem>>, vector<1x128xf32>
      %38 = vector.broadcast %37 : vector<1x128xf32> to vector<8x128xf32>
      %39 = arith.addf %36, %38 : vector<8x128xf32>
      %cst_25 = arith.constant 0.000000e+00 : f32
      %40 = vector.broadcast %cst_25 : f32 to vector<8x128xf32>
      %41 = arith.maximumf %39, %40 : vector<8x128xf32>
      %42 = arith.truncf %41 : vector<8x128xf32> to vector<8x128xbf16>
      %c0_26 = arith.constant 0 : index
      %c0_27 = arith.constant 0 : index
      %43 = vector.load %arg5[%c0_26, %c0_27] : memref<128x128xbf16, #tpu.memory_space<vmem>>, vector<128x128xbf16>
      %cst_28 = arith.constant dense<0.000000e+00> : vector<8x128xf32>
      %44 = tpu.matmul %42, %43, %cst_28 {dimension_numbers = #tpu.dot_dimension_numbers<[1], [0], [0], [1], [0, 0, 1, 1], [], []>} : vector<8x128xbf16>, vector<128x128xbf16>, vector<8x128xf32> -> vector<8x128xf32>
      %c0_29 = arith.constant 0 : index
      %c0_30 = arith.constant 0 : index
      %45 = vector.load %arg6[%c0_29, %c0_30] : memref<1x128xf32, #tpu.memory_space<vmem>>, vector<1x128xf32>
      %46 = vector.broadcast %45 : vector<1x128xf32> to vector<8x128xf32>
      %47 = arith.addf %44, %46 : vector<8x128xf32>
      %c0_31 = arith.constant 0 : index
      %c0_32 = arith.constant 0 : index
      %48 = vector.load %arg14[%c0_31, %c0_32] : memref<8x128xf32, #tpu.memory_space<vmem>>, vector<8x128xf32>
      tpu.vector_store %arg14[%c0_31, %c0_32], %47 {strides = array<i32>} : memref<8x128xf32, #tpu.memory_space<vmem>>, vector<8x128xf32>,
    } else {
    }
    %c0 = arith.constant 0 : index
    %c0_1 = arith.constant 0 : index
    %3 = vector.load %arg14[%c0, %c0_1] : memref<8x128xf32, #tpu.memory_space<vmem>>, vector<8x128xf32>
    %cst = arith.constant 0.000000e+00 : f32
    %4 = vector.broadcast %cst : f32 to vector<8x128xf32>
    %5 = arith.maximumf %3, %4 : vector<8x128xf32>
    %6 = arith.truncf %5 : vector<8x128xf32> to vector<8x128xbf16>
    %7 = arith.index_cast %arg1 : i32 to index
    %c0_2 = arith.constant 0 : index
    %c0_3 = arith.constant 0 : index
    %8 = vector.load %arg7[%7, %c0_2, %c0_3] : memref<2x128x128xbf16, #tpu.memory_space<vmem>>, vector<1x128x128xbf16>
    %9 = vector.shape_cast %8 : vector<1x128x128xbf16> to vector<128x128xbf16>
    %cst_4 = arith.constant dense<0.000000e+00> : vector<8x128xf32>
    %10 = tpu.matmul %6, %9, %cst_4 {dimension_numbers = #tpu.dot_dimension_numbers<[1], [0], [0], [1], [0, 0, 1, 1], [], []>} : vector<8x128xbf16>, vector<128x128xbf16>, vector<8x128xf32> -> vector<8x128xf32>
    %11 = arith.index_cast %arg1 : i32 to index
    %c0_5 = arith.constant 0 : index
    %c0_6 = arith.constant 0 : index
    %12 = vector.load %arg8[%11, %c0_5, %c0_6] : memref<2x1x128xf32, #tpu.memory_space<vmem>>, vector<1x1x128xf32>
    %13 = vector.shape_cast %12 : vector<1x1x128xf32> to vector<1x128xf32>
    %14 = vector.broadcast %13 : vector<1x128xf32> to vector<8x128xf32>
    %15 = arith.addf %10, %14 : vector<8x128xf32>
    %cst_7 = arith.constant 0.000000e+00 : f32
    %16 = vector.broadcast %cst_7 : f32 to vector<8x128xf32>
    %17 = arith.maximumf %15, %16 : vector<8x128xf32>
    %18 = arith.truncf %17 : vector<8x128xf32> to vector<8x128xbf16>
    %19 = arith.index_cast %arg1 : i32 to index
    %c0_8 = arith.constant 0 : index
    %c0_9 = arith.constant 0 : index
    %20 = vector.load %arg9[%19, %c0_8, %c0_9] : memref<2x128x128xbf16, #tpu.memory_space<vmem>>, vector<1x128x128xbf16>
    %21 = vector.shape_cast %20 : vector<1x128x128xbf16> to vector<128x128xbf16>
    %cst_10 = arith.constant dense<0.000000e+00> : vector<8x128xf32>
    %22 = tpu.matmul %18, %21, %cst_10 {dimension_numbers = #tpu.dot_dimension_numbers<[1], [0], [0], [1], [0, 0, 1, 1], [], []>} : vector<8x128xbf16>, vector<128x128xbf16>, vector<8x128xf32> -> vector<8x128xf32>
    %23 = arith.index_cast %arg1 : i32 to index
    %c0_11 = arith.constant 0 : index
    %c0_12 = arith.constant 0 : index
    %24 = vector.load %arg10[%23, %c0_11, %c0_12] : memref<2x1x128xf32, #tpu.memory_space<vmem>>, vector<1x1x128xf32>
    %25 = vector.shape_cast %24 : vector<1x1x128xf32> to vector<1x128xf32>
    %26 = vector.broadcast %25 : vector<1x128xf32> to vector<8x128xf32>
    %27 = arith.addf %22, %26 : vector<8x128xf32>
    %c0_13 = arith.constant 0 : index
    %c0_14 = arith.constant 0 : index
    %28 = vector.load %arg14[%c0_13, %c0_14] : memref<8x128xf32, #tpu.memory_space<vmem>>, vector<8x128xf32>
    %29 = arith.addf %27, %28 : vector<8x128xf32>
    %c0_15 = arith.constant 0 : index
    %c0_16 = arith.constant 0 : index
    %30 = vector.load %arg14[%c0_15, %c0_16] : memref<8x128xf32, #tpu.memory_space<vmem>>, vector<8x128xf32>
    tpu.vector_store %arg14[%c0_15, %c0_16], %29 {strides = array<i32>} : memref<8x128xf32, #tpu.memory_space<vmem>>, vector<8x128xf32>,
    %c1_i32 = arith.constant 1 : i32
    %31 = arith.cmpi eq, %arg1, %c1_i32 : i32
    %32 = arith.extui %31 : i1 to i32
    %c0_i32_17 = arith.constant 0 : i32
    %33 = arith.cmpi ne, %32, %c0_i32_17 : i32
    scf.if %33 {
      %c0_18 = arith.constant 0 : index
      %c0_19 = arith.constant 0 : index
      %34 = vector.load %arg14[%c0_18, %c0_19] : memref<8x128xf32, #tpu.memory_space<vmem>>, vector<8x128xf32>
      %cst_20 = arith.constant 0.000000e+00 : f32
      %35 = vector.broadcast %cst_20 : f32 to vector<8x128xf32>
      %36 = arith.maximumf %34, %35 : vector<8x128xf32>
      %37 = arith.truncf %36 : vector<8x128xf32> to vector<8x128xbf16>
      %c0_21 = arith.constant 0 : index
      %c0_22 = arith.constant 0 : index
      %38 = vector.load %arg11[%c0_21, %c0_22] : memref<128x128xbf16, #tpu.memory_space<vmem>>, vector<128x128xbf16>
      %cst_23 = arith.constant dense<0.000000e+00> : vector<8x128xf32>
      %39 = tpu.matmul %37, %38, %cst_23 {dimension_numbers = #tpu.dot_dimension_numbers<[1], [0], [0], [1], [0, 0, 1, 1], [], []>} : vector<8x128xbf16>, vector<128x128xbf16>, vector<8x128xf32> -> vector<8x128xf32>
      %c0_24 = arith.constant 0 : index
      %c0_25 = arith.constant 0 : index
      %40 = vector.load %arg12[%c0_24, %c0_25] : memref<1x128xf32, #tpu.memory_space<vmem>>, vector<1x128xf32>
      %41 = vector.broadcast %40 : vector<1x128xf32> to vector<8x128xf32>
      %42 = arith.addf %39, %41 : vector<8x128xf32>
      %c0_26 = arith.constant 0 : index
      %c0_27 = arith.constant 0 : index
      %43 = vector.load %arg13[%c0_26, %c0_27] : memref<8x128xf32, #tpu.memory_space<vmem>>, vector<8x128xf32>
      tpu.vector_store %arg13[%c0_26, %c0_27], %42 {strides = array<i32>} : memref<8x128xf32, #tpu.memory_space<vmem>>, vector<8x128xf32>,
    } else {
    }
    return
  }
  func.func @transform_0(%arg0: i32, %arg1: i32) -> (i32, i32) {
    %c0_i32 = arith.constant 0 : i32
    %c0_i32_0 = arith.constant 0 : i32
    return %arg0, %c0_i32 : i32, i32
  }
  func.func @transform_1(%arg0: i32, %arg1: i32) -> (i32, i32) {
    %c0_i32 = arith.constant 0 : i32
    %c0_i32_0 = arith.constant 0 : i32
    %c0_i32_1 = arith.constant 0 : i32
    return %c0_i32, %c0_i32_0 : i32, i32
  }
  func.func @transform_2(%arg0: i32, %arg1: i32) -> (i32, i32) {
    %c0_i32 = arith.constant 0 : i32
    %c0_i32_0 = arith.constant 0 : i32
    %c0_i32_1 = arith.constant 0 : i32
    return %c0_i32, %c0_i32_0 : i32, i32
  }
  func.func @transform_3(%arg0: i32, %arg1: i32) -> (i32, i32) {
    %c0_i32 = arith.constant 0 : i32
    %c0_i32_0 = arith.constant 0 : i32
    %c0_i32_1 = arith.constant 0 : i32
    return %c0_i32, %c0_i32_0 : i32, i32
  }
  func.func @transform_4(%arg0: i32, %arg1: i32) -> (i32, i32) {
    %c0_i32 = arith.constant 0 : i32
    %c0_i32_0 = arith.constant 0 : i32
    %c0_i32_1 = arith.constant 0 : i32
    return %c0_i32, %c0_i32_0 : i32, i32
  }
  func.func @transform_5(%arg0: i32, %arg1: i32) -> (i32, i32, i32) {
    %c0_i32 = arith.constant 0 : i32
    %c0_i32_0 = arith.constant 0 : i32
    %c0_i32_1 = arith.constant 0 : i32
    %c0_i32_2 = arith.constant 0 : i32
    return %c0_i32, %c0_i32_0, %c0_i32_1 : i32, i32, i32
  }
  func.func @transform_6(%arg0: i32, %arg1: i32) -> (i32, i32, i32) {
    %c0_i32 = arith.constant 0 : i32
    %c0_i32_0 = arith.constant 0 : i32
    %c0_i32_1 = arith.constant 0 : i32
    %c0_i32_2 = arith.constant 0 : i32
    return %c0_i32, %c0_i32_0, %c0_i32_1 : i32, i32, i32
  }
  func.func @transform_7(%arg0: i32, %arg1: i32) -> (i32, i32, i32) {
    %c0_i32 = arith.constant 0 : i32
    %c0_i32_0 = arith.constant 0 : i32
    %c0_i32_1 = arith.constant 0 : i32
    %c0_i32_2 = arith.constant 0 : i32
    return %c0_i32, %c0_i32_0, %c0_i32_1 : i32, i32, i32
  }
  func.func @transform_8(%arg0: i32, %arg1: i32) -> (i32, i32, i32) {
    %c0_i32 = arith.constant 0 : i32
    %c0_i32_0 = arith.constant 0 : i32
    %c0_i32_1 = arith.constant 0 : i32
    %c0_i32_2 = arith.constant 0 : i32
    return %c0_i32, %c0_i32_0, %c0_i32_1 : i32, i32, i32
  }
  func.func @transform_9(%arg0: i32, %arg1: i32) -> (i32, i32) {
    %c0_i32 = arith.constant 0 : i32
    %c0_i32_0 = arith.constant 0 : i32
    %c0_i32_1 = arith.constant 0 : i32
    return %c0_i32, %c0_i32_0 : i32, i32
  }
  func.func @transform_10(%arg0: i32, %arg1: i32) -> (i32, i32) {
    %c0_i32 = arith.constant 0 : i32
    %c0_i32_0 = arith.constant 0 : i32
    %c0_i32_1 = arith.constant 0 : i32
    return %c0_i32, %c0_i32_0 : i32, i32
  }
  func.func @transform_11(%arg0: i32, %arg1: i32) -> (i32, i32) {
    %c0_i32 = arith.constant 0 : i32
    %c0_i32_0 = arith.constant 0 : i32
    return %arg0, %c0_i32 : i32, i32
  }
}

module attributes {stable_mosaic.version = 11 : i64} {
  func.func @kernel(%arg0: i32, %arg1: i32, %arg2: memref<8x128xbf16, #tpu.memory_space<vmem>>, %arg3: memref<128x128xbf16, #tpu.memory_space<vmem>>, %arg4: memref<1x128xf32, #tpu.memory_space<vmem>>, %arg5: memref<128x128xbf16, #tpu.memory_space<vmem>>, %arg6: memref<1x128xf32, #tpu.memory_space<vmem>>, %arg7: memref<2x128x128xbf16, #tpu.memory_space<vmem>>, %arg8: memref<2x1x128xf32, #tpu.memory_space<vmem>>, %arg9: memref<2x128x128xbf16, #tpu.memory_space<vmem>>, %arg10: memref<2x1x128xf32, #tpu.memory_space<vmem>>, %arg11: memref<128x128xbf16, #tpu.memory_space<vmem>>, %arg12: memref<1x128xf32, #tpu.memory_space<vmem>>, %arg13: memref<8x128xf32, #tpu.memory_space<vmem>>, %arg14: memref<8x128xf32, #tpu.memory_space<vmem>>) attributes {dimension_semantics = [#tpu.dimension_semantics<parallel>, #tpu.dimension_semantics<arbitrary>], iteration_bounds = array<i64: 1, 2>, scalar_prefetch = 0 : i64, scratch_operands = 1 : i64, tpu.core_type = #tpu.core_type<tc>, window_params = [{transform_indices = @transform_0, window_bounds = array<i64: 8, 128>}, {pipeline_mode = #tpu.pipeline_mode<synchronous>, transform_indices = @transform_1, window_bounds = array<i64: 128, 128>}, {pipeline_mode = #tpu.pipeline_mode<synchronous>, transform_indices = @transform_2, window_bounds = array<i64: 1, 128>}, {pipeline_mode = #tpu.pipeline_mode<synchronous>, transform_indices = @transform_3, window_bounds = array<i64: 128, 128>}, {pipeline_mode = #tpu.pipeline_mode<synchronous>, transform_indices = @transform_4, window_bounds = array<i64: 1, 128>}, {pipeline_mode = #tpu.pipeline_mode<synchronous>, transform_indices = @transform_5, window_bounds = array<i64: 2, 128, 128>}, {pipeline_mode = #tpu.pipeline_mode<synchronous>, transform_indices = @transform_6, window_bounds = array<i64: 2, 1, 128>}, {pipeline_mode = #tpu.pipeline_mode<synchronous>, transform_indices = @transform_7, window_bounds = array<i64: 2, 128, 128>}, {pipeline_mode = #tpu.pipeline_mode<synchronous>, transform_indices = @transform_8, window_bounds = array<i64: 2, 1, 128>}, {pipeline_mode = #tpu.pipeline_mode<synchronous>, transform_indices = @transform_9, window_bounds = array<i64: 128, 128>}, {pipeline_mode = #tpu.pipeline_mode<synchronous>, transform_indices = @transform_10, window_bounds = array<i64: 1, 128>}, {transform_indices = @transform_11, window_bounds = array<i64: 8, 128>}]} {
    %c0_i32 = arith.constant 0 : i32
    %0 = arith.cmpi eq, %arg1, %c0_i32 : i32
    %1 = arith.extui %0 : i1 to i32
    %c0_i32_0 = arith.constant 0 : i32
    %2 = arith.cmpi ne, %1, %c0_i32_0 : i32
    scf.if %2 {
      %c0_18 = arith.constant 0 : index
      %c0_19 = arith.constant 0 : index
      %34 = vector.load %arg2[%c0_18, %c0_19] : memref<8x128xbf16, #tpu.memory_space<vmem>>, vector<8x128xbf16>
      %c0_20 = arith.constant 0 : index
      %c0_21 = arith.constant 0 : index
      %35 = vector.load %arg3[%c0_20, %c0_21] : memref<128x128xbf16, #tpu.memory_space<vmem>>, vector<128x128xbf16>
      %cst_22 = arith.constant dense<0.000000e+00> : vector<8x128xf32>
      %36 = tpu.matmul %34, %35, %cst_22 {dimension_numbers = #tpu.dot_dimension_numbers<[1], [0], [0], [1], [0, 0, 1, 1], [], []>} : vector<8x128xbf16>, vector<128x128xbf16>, vector<8x128xf32> -> vector<8x128xf32>
      %c0_23 = arith.constant 0 : index
      %c0_24 = arith.constant 0 : index
      %37 = vector.load %arg4[%c0_23, %c0_24] : memref<1x128xf32, #tpu.memory_space<vmem>>, vector<1x128xf32>
      %38 = vector.broadcast %37 : vector<1x128xf32> to vector<8x128xf32>
      %39 = arith.addf %36, %38 : vector<8x128xf32>
      %cst_25 = arith.constant 0.000000e+00 : f32
      %40 = vector.broadcast %cst_25 : f32 to vector<8x128xf32>
      %41 = arith.maximumf %39, %40 : vector<8x128xf32>
      %42 = arith.truncf %41 : vector<8x128xf32> to vector<8x128xbf16>
      %c0_26 = arith.constant 0 : index
      %c0_27 = arith.constant 0 : index
      %43 = vector.load %arg5[%c0_26, %c0_27] : memref<128x128xbf16, #tpu.memory_space<vmem>>, vector<128x128xbf16>
      %cst_28 = arith.constant dense<0.000000e+00> : vector<8x128xf32>
      %44 = tpu.matmul %42, %43, %cst_28 {dimension_numbers = #tpu.dot_dimension_numbers<[1], [0], [0], [1], [0, 0, 1, 1], [], []>} : vector<8x128xbf16>, vector<128x128xbf16>, vector<8x128xf32> -> vector<8x128xf32>
      %c0_29 = arith.constant 0 : index
      %c0_30 = arith.constant 0 : index
      %45 = vector.load %arg6[%c0_29, %c0_30] : memref<1x128xf32, #tpu.memory_space<vmem>>, vector<1x128xf32>
      %46 = vector.broadcast %45 : vector<1x128xf32> to vector<8x128xf32>
      %47 = arith.addf %44, %46 : vector<8x128xf32>
      %c0_31 = arith.constant 0 : index
      %c0_32 = arith.constant 0 : index
      %48 = vector.load %arg14[%c0_31, %c0_32] : memref<8x128xf32, #tpu.memory_space<vmem>>, vector<8x128xf32>
      tpu.vector_store %arg14[%c0_31, %c0_32], %47 {strides = array<i32>} : memref<8x128xf32, #tpu.memory_space<vmem>>, vector<8x128xf32>,
    } else {
    }
    %c0 = arith.constant 0 : index
    %c0_1 = arith.constant 0 : index
    %3 = vector.load %arg14[%c0, %c0_1] : memref<8x128xf32, #tpu.memory_space<vmem>>, vector<8x128xf32>
    %cst = arith.constant 0.000000e+00 : f32
    %4 = vector.broadcast %cst : f32 to vector<8x128xf32>
    %5 = arith.maximumf %3, %4 : vector<8x128xf32>
    %6 = arith.truncf %5 : vector<8x128xf32> to vector<8x128xbf16>
    %7 = arith.index_cast %arg1 : i32 to index
    %c0_2 = arith.constant 0 : index
    %c0_3 = arith.constant 0 : index
    %8 = vector.load %arg7[%7, %c0_2, %c0_3] : memref<2x128x128xbf16, #tpu.memory_space<vmem>>, vector<1x128x128xbf16>
    %9 = vector.shape_cast %8 : vector<1x128x128xbf16> to vector<128x128xbf16>
    %cst_4 = arith.constant dense<0.000000e+00> : vector<8x128xf32>
    %10 = tpu.matmul %6, %9, %cst_4 {dimension_numbers = #tpu.dot_dimension_numbers<[1], [0], [0], [1], [0, 0, 1, 1], [], []>} : vector<8x128xbf16>, vector<128x128xbf16>, vector<8x128xf32> -> vector<8x128xf32>
    %11 = arith.index_cast %arg1 : i32 to index
    %c0_5 = arith.constant 0 : index
    %c0_6 = arith.constant 0 : index
    %12 = vector.load %arg8[%11, %c0_5, %c0_6] : memref<2x1x128xf32, #tpu.memory_space<vmem>>, vector<1x1x128xf32>
    %13 = vector.shape_cast %12 : vector<1x1x128xf32> to vector<1x128xf32>
    %14 = vector.broadcast %13 : vector<1x128xf32> to vector<8x128xf32>
    %15 = arith.addf %10, %14 : vector<8x128xf32>
    %cst_7 = arith.constant 0.000000e+00 : f32
    %16 = vector.broadcast %cst_7 : f32 to vector<8x128xf32>
    %17 = arith.maximumf %15, %16 : vector<8x128xf32>
    %18 = arith.truncf %17 : vector<8x128xf32> to vector<8x128xbf16>
    %19 = arith.index_cast %arg1 : i32 to index
    %c0_8 = arith.constant 0 : index
    %c0_9 = arith.constant 0 : index
    %20 = vector.load %arg9[%19, %c0_8, %c0_9] : memref<2x128x128xbf16, #tpu.memory_space<vmem>>, vector<1x128x128xbf16>
    %21 = vector.shape_cast %20 : vector<1x128x128xbf16> to vector<128x128xbf16>
    %cst_10 = arith.constant dense<0.000000e+00> : vector<8x128xf32>
    %22 = tpu.matmul %18, %21, %cst_10 {dimension_numbers = #tpu.dot_dimension_numbers<[1], [0], [0], [1], [0, 0, 1, 1], [], []>} : vector<8x128xbf16>, vector<128x128xbf16>, vector<8x128xf32> -> vector<8x128xf32>
    %23 = arith.index_cast %arg1 : i32 to index
    %c0_11 = arith.constant 0 : index
    %c0_12 = arith.constant 0 : index
    %24 = vector.load %arg10[%23, %c0_11, %c0_12] : memref<2x1x128xf32, #tpu.memory_space<vmem>>, vector<1x1x128xf32>
    %25 = vector.shape_cast %24 : vector<1x1x128xf32> to vector<1x128xf32>
    %26 = vector.broadcast %25 : vector<1x128xf32> to vector<8x128xf32>
    %27 = arith.addf %22, %26 : vector<8x128xf32>
    %c0_13 = arith.constant 0 : index
    %c0_14 = arith.constant 0 : index
    %28 = vector.load %arg14[%c0_13, %c0_14] : memref<8x128xf32, #tpu.memory_space<vmem>>, vector<8x128xf32>
    %29 = arith.addf %27, %28 : vector<8x128xf32>
    %c0_15 = arith.constant 0 : index
    %c0_16 = arith.constant 0 : index
    %30 = vector.load %arg14[%c0_15, %c0_16] : memref<8x128xf32, #tpu.memory_space<vmem>>, vector<8x128xf32>
    tpu.vector_store %arg14[%c0_15, %c0_16], %29 {strides = array<i32>} : memref<8x128xf32, #tpu.memory_space<vmem>>, vector<8x128xf32>,
    %c1_i32 = arith.constant 1 : i32
    %31 = arith.cmpi eq, %arg1, %c1_i32 : i32
    %32 = arith.extui %31 : i1 to i32
    %c0_i32_17 = arith.constant 0 : i32
    %33 = arith.cmpi ne, %32, %c0_i32_17 : i32
    scf.if %33 {
      %c0_18 = arith.constant 0 : index
      %c0_19 = arith.constant 0 : index
      %34 = vector.load %arg14[%c0_18, %c0_19] : memref<8x128xf32, #tpu.memory_space<vmem>>, vector<8x128xf32>
      %cst_20 = arith.constant 0.000000e+00 : f32
      %35 = vector.broadcast %cst_20 : f32 to vector<8x128xf32>
      %36 = arith.maximumf %34, %35 : vector<8x128xf32>
      %37 = arith.truncf %36 : vector<8x128xf32> to vector<8x128xbf16>
      %c0_21 = arith.constant 0 : index
      %c0_22 = arith.constant 0 : index
      %38 = vector.load %arg11[%c0_21, %c0_22] : memref<128x128xbf16, #tpu.memory_space<vmem>>, vector<128x128xbf16>
      %cst_23 = arith.constant dense<0.000000e+00> : vector<8x128xf32>
      %39 = tpu.matmul %37, %38, %cst_23 {dimension_numbers = #tpu.dot_dimension_numbers<[1], [0], [0], [1], [0, 0, 1, 1], [], []>} : vector<8x128xbf16>, vector<128x128xbf16>, vector<8x128xf32> -> vector<8x128xf32>
      %c0_24 = arith.constant 0 : index
      %c0_25 = arith.constant 0 : index
      %40 = vector.load %arg12[%c0_24, %c0_25] : memref<1x128xf32, #tpu.memory_space<vmem>>, vector<1x128xf32>
      %41 = vector.broadcast %40 : vector<1x128xf32> to vector<8x128xf32>
      %42 = arith.addf %39, %41 : vector<8x128xf32>
      %c0_26 = arith.constant 0 : index
      %c0_27 = arith.constant 0 : index
      %43 = vector.load %arg13[%c0_26, %c0_27] : memref<8x128xf32, #tpu.memory_space<vmem>>, vector<8x128xf32>
      tpu.vector_store %arg13[%c0_26, %c0_27], %42 {strides = array<i32>} : memref<8x128xf32, #tpu.memory_space<vmem>>, vector<8x128xf32>,
    } else {
    }
    return
  }
  func.func @transform_0(%arg0: i32, %arg1: i32) -> (i32, i32) {
    %c0_i32 = arith.constant 0 : i32
    %c0_i32_0 = arith.constant 0 : i32
    return %arg0, %c0_i32 : i32, i32
  }
  func.func @transform_1(%arg0: i32, %arg1: i32) -> (i32, i32) {
    %c0_i32 = arith.constant 0 : i32
    %c0_i32_0 = arith.constant 0 : i32
    %c0_i32_1 = arith.constant 0 : i32
    return %c0_i32, %c0_i32_0 : i32, i32
  }
  func.func @transform_2(%arg0: i32, %arg1: i32) -> (i32, i32) {
    %c0_i32 = arith.constant 0 : i32
    %c0_i32_0 = arith.constant 0 : i32
    %c0_i32_1 = arith.constant 0 : i32
    return %c0_i32, %c0_i32_0 : i32, i32
  }
  func.func @transform_3(%arg0: i32, %arg1: i32) -> (i32, i32) {
    %c0_i32 = arith.constant 0 : i32
    %c0_i32_0 = arith.constant 0 : i32
    %c0_i32_1 = arith.constant 0 : i32
    return %c0_i32, %c0_i32_0 : i32, i32
  }
  func.func @transform_4(%arg0: i32, %arg1: i32) -> (i32, i32) {
    %c0_i32 = arith.constant 0 : i32
    %c0_i32_0 = arith.constant 0 : i32
    %c0_i32_1 = arith.constant 0 : i32
    return %c0_i32, %c0_i32_0 : i32, i32
  }
  func.func @transform_5(%arg0: i32, %arg1: i32) -> (i32, i32, i32) {
    %c0_i32 = arith.constant 0 : i32
    %c0_i32_0 = arith.constant 0 : i32
    %c0_i32_1 = arith.constant 0 : i32
    %c0_i32_2 = arith.constant 0 : i32
    return %c0_i32, %c0_i32_0, %c0_i32_1 : i32, i32, i32
  }
  func.func @transform_6(%arg0: i32, %arg1: i32) -> (i32, i32, i32) {
    %c0_i32 = arith.constant 0 : i32
    %c0_i32_0 = arith.constant 0 : i32
    %c0_i32_1 = arith.constant 0 : i32
    %c0_i32_2 = arith.constant 0 : i32
    return %c0_i32, %c0_i32_0, %c0_i32_1 : i32, i32, i32
  }
  func.func @transform_7(%arg0: i32, %arg1: i32) -> (i32, i32, i32) {
    %c0_i32 = arith.constant 0 : i32
    %c0_i32_0 = arith.constant 0 : i32
    %c0_i32_1 = arith.constant 0 : i32
    %c0_i32_2 = arith.constant 0 : i32
    return %c0_i32, %c0_i32_0, %c0_i32_1 : i32, i32, i32
  }
  func.func @transform_8(%arg0: i32, %arg1: i32) -> (i32, i32, i32) {
    %c0_i32 = arith.constant 0 : i32
    %c0_i32_0 = arith.constant 0 : i32
    %c0_i32_1 = arith.constant 0 : i32
    %c0_i32_2 = arith.constant 0 : i32
    return %c0_i32, %c0_i32_0, %c0_i32_1 : i32, i32, i32
  }
  func.func @transform_9(%arg0: i32, %arg1: i32) -> (i32, i32) {
    %c0_i32 = arith.constant 0 : i32
    %c0_i32_0 = arith.constant 0 : i32
    %c0_i32_1 = arith.constant 0 : i32
    return %c0_i32, %c0_i32_0 : i32, i32
  }
  func.func @transform_10(%arg0: i32, %arg1: i32) -> (i32, i32) {
    %c0_i32 = arith.constant 0 : i32
    %c0_i32_0 = arith.constant 0 : i32
    %c0_i32_1 = arith.constant 0 : i32
    return %c0_i32, %c0_i32_0 : i32, i32
  }
  func.func @transform_11(%arg0: i32, %arg1: i32) -> (i32, i32) {
    %c0_i32 = arith.constant 0 : i32
    %c0_i32_0 = arith.constant 0 : i32
    return %arg0, %c0_i32 : i32, i32
  }
}

</mosaic_0001>

<bundles_post_ra>
// kernel: tpu_custom_call.1
= control target key start
LH: loop header
LB: loop body
LE: loop exit
PB: predicated region body
PF: predicated region fallthrough
CT: control target
= control target key end

     0   :  { %16 = vsyncpa [#allocation4], 0  ;;  %s2005_s0 = inlined_call_operand.hbm [shape: bf16[8,128], index: 0, kind: input, shape index: {}]   ;;  %s2006_s1 = inlined_call_operand.hbm [shape: bf16[128,128], index: 1, kind: input, shape index: {}]   ;;  %s2007_s2 = inlined_call_operand.vmem [shape: f32[1,128], index: 2, kind: input, shape index: {}]   ;;  %s2008_s3 = inlined_call_operand.hbm [shape: bf16[128,128], index: 3, kind: input, shape index: {}]   ;;  %s2009_s4 = inlined_call_operand.vmem [shape: f32[1,128], index: 4, kind: input, shape index: {}]   ;;  %s2010_s5 = inlined_call_operand.hbm [shape: bf16[2,128,128], index: 5, kind: input, shape index: {}]   ;;  %s2011_s6 = inlined_call_operand.vmem [shape: f32[2,1,128], index: 6, kind: input, shape index: {}]   ;;  %s2012_s7 = inlined_call_operand.hbm [shape: bf16[2,128,128], index: 7, kind: input, shape index: {}]   ;;  %s2013_s8 = inlined_call_operand.vmem [shape: f32[2,1,128], index: 8, kind: input, shape index: {}]   ;;  %s2014_s9 = inlined_call_operand.hbm [shape: bf16[128,128], index: 9, kind: input, shape index: {}]   ;;  %s2015_s10 = inlined_call_operand.vmem [shape: f32[1,128], index: 10, kind: input, shape index: {}]   ;;  %s2016_s11 = inlined_call_operand.hbm [shape: f32[8,128], index: 11, kind: output, shape index: {}]  }
   0x1   :  { %17 = vsyncpa [#allocation7], 0 }
   0x2   :  { %18 = vsyncpa [#allocation10], 0 }
   0x3   :  { %19 = vsyncpa [#allocation13], 0 }
   0x4   :  { %20 = vsyncpa [#allocation5], 0  ;;  %s1819_s17 = smov 0   ;;  %s1821_s18 = smov 0  }
   0x5   :  { %s1823_s19 = smov 0  }
   0x6 LB: > { %s1744_s20 = smov [#allocation6]   ;;  %s2020_s22 = sadd.s32 4294967295, %s1742_s19   ;;  %s1742_s19 = sphi %s1823_s19, %s26_s19   ;;  %s1738_s18 = sphi %s1821_s18, %s2030_s18   ;;  %s1734_s17 = sphi %s1819_s17, %s2029_s17  }
   0x7   : > { %s330_s21 = sshll.u32 %s1744_s20, 4  ;;  %p1165_p0 = scmp.ge.s32.totalorder %s1742_s19, 1  ;;  %s331_s21 = int_to_ptr.vmem [resolvable:$true] %s330_s21 }
   0x8   : > { %p305_p1 = scmp.lt.s32.totalorder %s1742_s19, 3  ;;  %p1839_p2 = scmp.eq.s32.totalorder %s2020_s22, 0 }
   0x9   : > { %s1745_s25 = smov [#allocation9]   ;;  %s35_s28 = sadd.s32 1, %s1738_s18 }
   0xa   : > { %s2021_s23 = scalar_select %p1839_p2, 1, 0 }
   0xb   : > { %p1843_p3 = pnand %p1165_p0, %p305_p1  ;;  %s362_s26 = sshll.u32 %s1745_s25, 4  ;;  %s363_s26 = int_to_ptr.vmem [resolvable:$true] %s362_s26 }
   0xc   : > { %s1531_s30 = scalar_lea.vmem %s331_s21, 1024  ;;  %p1539_p10 = scmp.lt.s32.totalorder %s331_s21, %s331_s21 }
   0xd   : > { %s2022_s24 = scalar_select %p1843_p3, 1, 0 }
   0xe   : > { %p1408_p4 = pneg %p1843_p3  ;;  %p1532_p7 = scmp.ne.s32.totalorder %s331_s21, %s1531_s30 }
   0xf   : > { %p1540_p11 = scmp.lt.s32.totalorder %s1531_s30, %s1531_s30 }
  0x10   : > { %p1851_p5 = pnand %p1839_p2, %p1408_p4 }
  0x11   : > { %p1541_p12 = por %p1540_p11, %p1539_p10 }
  0x12   : > { %p1858_p6 = pneg %p1851_p5 }
  0x14   : > { %p1534_p8 = pnand %p1532_p7, %p1858_p6 }
  0x16   : > { %p1535_p9 = pneg %p1534_p8 }
  0x18   : > { %p1542_p13 = pnand %p1541_p12, %p1535_p9 }
  0x1a   : > { %1545 = shalt.err (!%p1542_p13)
}
  0x1b   : > { %s1746_s12 = smov 64   ;;  %s1747_s13 = smov 4  }
  0x1c   : > { %1414 = dma.hbm_to_vmem [thread:$0]  (!%p1851_p5), %s2006_s1, 1024, %s331_s21, [#allocation7], %s1746_s12, %s1746_s12, %s1747_s13  }
  0x1d   : > { %s1557_s16 = scalar_lea.vmem %s363_s26, 2048  ;;  %p1565_p7 = scmp.lt.s32.totalorder %s363_s26, %s363_s26 }
  0x1e   : > { %p1558_p0 = scmp.ne.s32.totalorder %s363_s26, %s1557_s16  ;;  %p1566_p8 = scmp.lt.s32.totalorder %s1557_s16, %s1557_s16 }
  0x20   : > { %p1560_p1 = pnand %p1558_p0, %p1858_p6  ;;  %p1567_p9 = por %p1566_p8, %p1565_p7 }
  0x22   : > { %p1561_p4 = pneg %p1560_p1 }
  0x24   : > { %p1568_p10 = pnand %p1567_p9, %p1561_p4 }
  0x26   : > { %1571 = shalt.err (!%p1568_p10)
}
  0x27   : > { %1420 = dma.hbm_to_vmem [thread:$0]  (!%p1851_p5), %s2010_s5, 2048, %s363_s26, [#allocation10], %s1746_s12, %s1746_s12, %s1747_s13  }
  0x28   : > { %p36_p11 = scmp.ge.s32.totalorder %s35_s28, 2  ;;  %s1748_s21 = smov [#allocation3]  }
  0x29   : > { %s320_s30 = sshll.u32 %s1748_s21, 4  ;;  %s1749_s14 = smov [#allocation8]   ;;  %s321_s30 = int_to_ptr.vmem [resolvable:$true] %s320_s30 }
  0x2a   : > { %s2032_s28 = smov (%p36_p11, %s35_s28), 0  ;;  %s346_s15 = sshll.u32 %s1749_s14, 4  ;;  %s347_s15 = int_to_ptr.vmem [resolvable:$true] %s346_s15 }
  0x2b   : > { %s1583_s16 = scalar_lea.vmem %s321_s30, 64  ;;  %p1591_p1 = scmp.lt.s32.totalorder %s321_s30, %s321_s30 }
  0x2c   : > { %p1584_p12 = scmp.ne.s32.totalorder %s321_s30, %s1583_s16  ;;  %p1592_p4 = scmp.lt.s32.totalorder %s1583_s16, %s1583_s16 }
  0x2e   : > { %p1586_p13 = pnand %p1584_p12, %p1858_p6  ;;  %p1593_p7 = por %p1592_p4, %p1591_p1 }
  0x30   : > { %p1587_p0 = pneg %p1586_p13 }
  0x32   : > { %p1594_p8 = pnand %p1593_p7, %p1587_p0 }
  0x34   : > { %1597 = shalt.err (!%p1594_p8)
}
  0x35   : > { %1411 = dma.hbm_to_vmem [thread:$0]  (!%p1851_p5), %s2005_s0, 64, %s321_s30, [#allocation4]  }
  0x36   : > { %s1609_s25 = scalar_lea.vmem %s347_s15, 1024  ;;  %p1617_p12 = scmp.lt.s32.totalorder %s347_s15, %s347_s15 }
  0x37   : > { %p1610_p9 = scmp.ne.s32.totalorder %s347_s15, %s1609_s25  ;;  %p1618_p13 = scmp.lt.s32.totalorder %s1609_s25, %s1609_s25 }
  0x39   : > { %p1612_p10 = pnand %p1610_p9, %p1858_p6  ;;  %p1619_p2 = por %p1618_p13, %p1617_p12 }
  0x3b   : > { %p1613_p11 = pneg %p1612_p10 }
  0x3d   : > { %p1620_p3 = pnand %p1619_p2, %p1613_p11 }
  0x3f   : > { %1623 = shalt.err (!%p1620_p3)
}
  0x40   : > { %1417 = dma.hbm_to_vmem [thread:$0]  (!%p1851_p5), %s2008_s3, 1024, %s347_s15, [#allocation7], %s1746_s12, %s1746_s12, %s1747_s13  }
  0x41   : > { %s1750_s30 = smov [#allocation11]   ;;  %s1751_s26 = smov [#allocation12]  }
  0x42   : > { %s378_s16 = sshll.u32 %s1750_s30, 4  ;;  %s394_s20 = sshll.u32 %s1751_s26, 4  ;;  %s379_s16 = int_to_ptr.vmem [resolvable:$true] %s378_s16  ;;  %s395_s20 = int_to_ptr.vmem [resolvable:$true] %s394_s20 }
  0x43   : > { %s1635_s22 = scalar_lea.vmem %s379_s16, 2048  ;;  %p1643_p1 = scmp.lt.s32.totalorder %s379_s16, %s379_s16 }
  0x44   : > { %p1636_p0 = scmp.ne.s32.totalorder %s379_s16, %s1635_s22  ;;  %p1644_p4 = scmp.lt.s32.totalorder %s1635_s22, %s1635_s22 }
  0x46   : > { %p1638_p2 = pnand %p1636_p0, %p1858_p6  ;;  %p1645_p7 = por %p1644_p4, %p1643_p1 }
  0x48   : > { %p1639_p3 = pneg %p1638_p2 }
  0x4a   : > { %p1646_p8 = pnand %p1645_p7, %p1639_p3 }
  0x4c   : > { %1649 = shalt.err (!%p1646_p8)
}
  0x4d   : > { %1423 = dma.hbm_to_vmem [thread:$0]  (!%p1851_p5), %s2012_s7, 2048, %s379_s16, [#allocation10], %s1746_s12, %s1746_s12, %s1747_s13  }
  0x4e   : > { %s1661_s21 = scalar_lea.vmem %s395_s20, 1024  ;;  %p1669_p12 = scmp.lt.s32.totalorder %s395_s20, %s395_s20 }
  0x4f   : > { %p1662_p9 = scmp.ne.s32.totalorder %s395_s20, %s1661_s21  ;;  %p1670_p13 = scmp.lt.s32.totalorder %s1661_s21, %s1661_s21 }
  0x51   : > { %p1664_p10 = pnand %p1662_p9, %p1858_p6  ;;  %p1671_p0 = por %p1670_p13, %p1669_p12 }
  0x53   : > { %p1665_p11 = pneg %p1664_p10 }
  0x55   : > { %p1672_p2 = pnand %p1671_p0, %p1665_p11 }
  0x57   : > { %1675 = shalt.err (!%p1672_p2)
}
  0x58   : > { %1426 = dma.hbm_to_vmem [thread:$0]  (!%p1851_p5), %s2014_s9, 1024, %s395_s20, [#allocation13], %s1746_s12, %s1746_s12, %s1747_s13  }
  0x59   : > { %p2025_p3 = scmp.ne.s32.totalorder %s2022_s24, 0 }
  0x5a   : > { %p2026_p6 = scmp.ne.s32.totalorder (!%p2025_p3), %s2021_s23, 0 }
  0x5b   : > { %413 = sbr.rel (%p2025_p3) target bundleno = 1220 (0x4c4), region = 64 }
  0x60   : > { %1713 = dma.done.wait (%p2026_p6), [#allocation4], 64  }
  0x61   : > { %1715 = vsyncadd (%p2026_p6), [#allocation4], 4294967232 }
  0x62   : > { %1717 = dma.done.wait (%p2026_p6), [#allocation7], 2048  }
  0x63   : > { %1719 = vsyncadd (%p2026_p6), [#allocation7], 4294965248 }
  0x64   : > { %1721 = dma.done.wait (%p2026_p6), [#allocation10], 4096  }
  0x65   : > { %1723 = vsyncadd (%p2026_p6), [#allocation10], 4294963200 }
  0x66   : > { %1725 = dma.done.wait (%p2026_p6), [#allocation13], 1024  }
  0x67   : > { %1727 = vsyncadd (%p2026_p6), [#allocation13], 4294966272  ;;  %p1179_p5 = scmp.ne.s32.totalorder %s1734_s17, 0 }
  0x69   : > { %467 = sbr.rel (%p1179_p5) target bundleno = 541 (0x21d), region = 92 }
  0x6e   : > { %v1480_v0 = vld [vmem:[#allocation6 + $0x38] sm:$0xff]   ;;  %v1752_v1 = vmov 0.0   ;;  %v1481_v2 = vld [vmem:[#allocation6 + $0x30] sm:$0xff]   ;;  %vm1753_vm0 = vmmov 0   ;;  %v1482_v3 = vld [vmem:[#allocation6 + $0x28] sm:$0xff]  }
  0x6f   : > { %1280 = vmatprep.subr.bf16.mxu0 %v1752_v1  ;;  %1300 = vmatprep.subr.bf16.mxu1 %v1752_v1  ;;  %v1488_v4 = vld [vmem:[#allocation8 + $0x38] sm:$0xff]   ;;  %v1483_v5 = vld [vmem:[#allocation6 + $0x20] sm:$0xff]   ;;  %v1489_v6 = vld [vmem:[#allocation8 + $0x30] sm:$0xff]  }
  0x70   : > { %1281 = vmatpush3.bf16.msra.mxu0 %v1480_v0  ;;  %1296 = vmatprep.mubr.msk.bf16.mxu0 %vm1753_vm0, %v1752_v1  ;;  %v1484_v7 = vld [vmem:[#allocation6 + $0x18] sm:$0xff]   ;;  %v1490_v8 = vld [vmem:[#allocation8 + $0x28] sm:$0xff]   ;;  %v1485_v9 = vld [vmem:[#allocation6 + $0x10] sm:$0xff]  }
  0x71   : > { %1282 = vmatprep.subr.bf16.mxu0 %v1752_v1  ;;  %1316 = vmatprep.mubr.msk.bf16.mxu1 %vm1753_vm0, %v1752_v1  ;;  %v1491_v10 = vld [vmem:[#allocation8 + $0x20] sm:$0xff]   ;;  %v1486_v11 = vld [vmem:[#allocation6 + $0x8] sm:$0xff]   ;;  %v1492_v12 = vld [vmem:[#allocation8 + $0x18] sm:$0xff]  }
  0x72   : > { %1301 = vmatpush3.bf16.msra.mxu1 %v1488_v4  ;;  %v1487_v13 = vld [vmem:[#allocation6] sm:$0xff]   ;;  %v1493_v14 = vld [vmem:[#allocation8 + $0x10] sm:$0xff]   ;;  %v468_v15 = vld [vmem:[#allocation3] sm:$0xf] }
  0x73   : > { %1302 = vmatprep.subr.bf16.mxu1 %v1752_v1  ;;  %v1494_v16 = vld [vmem:[#allocation8 + $0x8] sm:$0xff]   ;;  %v1495_v17 = vld [vmem:[#allocation8] sm:$0xff]   ;;  %v1180_v18 = vld [vmem:[%s2007_s2] ss:$0 sm:$0xff] }
  0x74   : > { %1283 = vmatpush3.bf16.msra.mxu0 %v1481_v2  ;;  %v1189_v26 = vld [vmem:[%s2009_s4] ss:$0 sm:$0xff] }
  0x75   : > { %1284 = vmatprep.subr.bf16.mxu0 %v1752_v1 }
  0x76   : > { %1303 = vmatpush3.bf16.msra.mxu1 %v1489_v6 }
  0x77   : > { %1304 = vmatprep.subr.bf16.mxu1 %v1752_v1 }
  0x78   : > { %1285 = vmatpush3.bf16.msra.mxu0 %v1482_v3 }
  0x79   : > { %1286 = vmatprep.subr.bf16.mxu0 %v1752_v1 }
  0x7a   : > { %1305 = vmatpush3.bf16.msra.mxu1 %v1490_v8 }
  0x7b   : > { %1306 = vmatprep.subr.bf16.mxu1 %v1752_v1 }
  0x7c   : > { %1287 = vmatpush3.bf16.msra.mxu0 %v1483_v5 }
  0x7d   : > { %1288 = vmatprep.subr.bf16.mxu0 %v1752_v1 }
  0x7e   : > { %1307 = vmatpush3.bf16.msra.mxu1 %v1491_v10 }
  0x7f   : > { %1308 = vmatprep.subr.bf16.mxu1 %v1752_v1 }
  0x80   : > { %1289 = vmatpush3.bf16.msra.mxu0 %v1484_v7 }
  0x81   : > { %1290 = vmatprep.subr.bf16.mxu0 %v1752_v1 }
  0x82   : > { %1309 = vmatpush3.bf16.msra.mxu1 %v1492_v12 }
  0x83   : > { %1310 = vmatprep.subr.bf16.mxu1 %v1752_v1 }
  0x84   : > { %1291 = vmatpush3.bf16.msra.mxu0 %v1485_v9 }
  0x85   : > { %1292 = vmatprep.subr.bf16.mxu0 %v1752_v1 }
  0x86   : > { %1311 = vmatpush3.bf16.msra.mxu1 %v1493_v14 }
  0x87   : > { %1312 = vmatprep.subr.bf16.mxu1 %v1752_v1 }
  0x88   : > { %1293 = vmatpush3.bf16.msra.mxu0 %v1486_v11 }
  0x89   : > { %1294 = vmatprep.subr.bf16.mxu0 %v1752_v1 }
  0x8a   : > { %1313 = vmatpush3.bf16.msra.mxu1 %v1494_v16 }
  0x8b   : > { %1314 = vmatprep.subr.bf16.mxu1 %v1752_v1 }
  0x8c   : > { %1295 = vmatpush3.bf16.msra.mxu0 %v1487_v13 }
  0x8e   : > { %1315 = vmatpush3.bf16.msra.mxu1 %v1495_v17 }
  0x8f   : > { %1297 = vmatmul.mubr.bf16.vlgmr.msra.gmra.mxu0 %v468_v15 }
 0x14f   : > { %v574_v19 = vpop.f32.mrf.mxu0 }
 0x150   : > { %v575_v20 = vadd.f32 %v1180_v18, %v574_v19 }
 0x151   : > { %v1298_v21 = vpop.f32.mrf.mxu0 }
 0x152   : > { %v580_v22 = vmax.f32 %v575_v20, 0.0 }
 0x153   : > { %v577_v23 = vpop.f32.mrf.mxu0 }
 0x154   : > { %v581_v24 = vpack.c.bf16 %v580_v22, %v580_v22 }
 0x155   : > { %v1299_v25 = vpop.f32.mrf.mxu0 }
 0x156   : > { %1317 = vmatmul.mubr.bf16.vlgmr.msra.gmra.mxu1 %v581_v24 }
 0x216   : > { %v687_v27 = vpop.f32.mrf.mxu1 }
 0x217   : > { %v688_v28 = vadd.f32 %v1189_v26, %v687_v27 }
 0x218   : > { %v1318_v29 = vpop.f32.mrf.mxu1 }
 0x219   : > { %693 = vst [vmem:[#allocation2] sm:$0xff] %v688_v28 }
 0x21a   : > { %v690_v30 = vpop.f32.mrf.mxu1 }
 0x21c   : > { %v1319_v31 = vpop.f32.mrf.mxu1 }
 0x21d PF: > { %s1233_s12 = sshll.u32 %s1734_s17, 6  ;;  %v1754_v32 = vmov 0.0   ;;  %vm1755_vm1 = vmmov 0   ;;  %s716_s20 = scalar_lea.vmem %s2011_s6, %s1734_s17 }
 0x21e   : > { %1320 = vmatprep.subr.bf16.mxu0 %v1754_v32  ;;  %1336 = vmatprep.mubr.msk.bf16.mxu0 %vm1755_vm1, %v1754_v32  ;;  %s1947_s13 = scalar_lea.vmem [#allocation9], %s1233_s12  ;;  %s1952_s30 = scalar_lea.vmem [#allocation11], %s1233_s12  ;;  %v1200_v52 = vld [vmem:[%s716_s20] ss:$0 sm:$0xff] }
 0x21f   : > { %v1496_v33 = vld [vmem:[%s1947_s13 + $0x38] sm:$0xff]   ;;  %1340 = vmatprep.subr.bf16.mxu1 %v1754_v32  ;;  %1356 = vmatprep.mubr.msk.bf16.mxu1 %vm1755_vm1, %v1754_v32  ;;  %v1497_v34 = vld [vmem:[%s1947_s13 + $0x30] sm:$0xff]   ;;  %v1498_v35 = vld [vmem:[%s1947_s13 + $0x28] sm:$0xff]   ;;  %s832_s21 = scalar_lea.vmem %s2013_s8, %s1734_s17  ;;  %p1219_p1 = scmp.ne.s32.totalorder %s1734_s17, 1 }
 0x220   : > { %1321 = vmatpush3.bf16.msra.mxu0 %v1496_v33  ;;  %v1504_v36 = vld [vmem:[%s1952_s30 + $0x38] sm:$0xff]   ;;  %v1499_v37 = vld [vmem:[%s1947_s13 + $0x20] sm:$0xff]   ;;  %v1505_v38 = vld [vmem:[%s1952_s30 + $0x30] sm:$0xff]  }
 0x221   : > { %1322 = vmatprep.subr.bf16.mxu0 %v1754_v32  ;;  %1341 = vmatpush3.bf16.msra.mxu1 %v1504_v36  ;;  %v1500_v39 = vld [vmem:[%s1947_s13 + $0x18] sm:$0xff]   ;;  %v1506_v40 = vld [vmem:[%s1952_s30 + $0x28] sm:$0xff]   ;;  %v1501_v41 = vld [vmem:[%s1947_s13 + $0x10] sm:$0xff]  }
 0x222   : > { %1342 = vmatprep.subr.bf16.mxu1 %v1754_v32  ;;  %v1507_v42 = vld [vmem:[%s1952_s30 + $0x20] sm:$0xff]   ;;  %v1502_v43 = vld [vmem:[%s1947_s13 + $0x8] sm:$0xff]   ;;  %v1508_v45 = vld [vmem:[%s1952_s30 + $0x18] sm:$0xff]  }
 0x223   : > { %v694_v44 = vld [vmem:[#allocation2] sm:$0xff]  ;;  %v1509_v48 = vld [vmem:[%s1952_s30 + $0x10] sm:$0xff]   ;;  %v1510_v50 = vld [vmem:[%s1952_s30 + $0x8] sm:$0xff]  }
 0x224   : > { %1323 = vmatpush3.bf16.msra.mxu0 %v1497_v34  ;;  %v695_v46 = vmax.f32 %v694_v44, 0.0  ;;  %v1503_v47 = vld [vmem:[%s1947_s13] sm:$0xff]  }
 0x225   : > { %1324 = vmatprep.subr.bf16.mxu0 %v1754_v32  ;;  %1343 = vmatpush3.bf16.msra.mxu1 %v1505_v38  ;;  %v1511_v51 = vld [vmem:[%s1952_s30] sm:$0xff]  }
 0x226   : > { %1344 = vmatprep.subr.bf16.mxu1 %v1754_v32  ;;  %v696_v49 = vpack.c.bf16 %v695_v46, %v695_v46  ;;  %v1210_v60 = vld [vmem:[%s832_s21] ss:$0 sm:$0xff] }
 0x228   : > { %1325 = vmatpush3.bf16.msra.mxu0 %v1498_v35 }
 0x229   : > { %1326 = vmatprep.subr.bf16.mxu0 %v1754_v32  ;;  %1345 = vmatpush3.bf16.msra.mxu1 %v1506_v40 }
 0x22a   : > { %1346 = vmatprep.subr.bf16.mxu1 %v1754_v32 }
 0x22c   : > { %1327 = vmatpush3.bf16.msra.mxu0 %v1499_v37 }
 0x22d   : > { %1328 = vmatprep.subr.bf16.mxu0 %v1754_v32  ;;  %1347 = vmatpush3.bf16.msra.mxu1 %v1507_v42 }
 0x22e   : > { %1348 = vmatprep.subr.bf16.mxu1 %v1754_v32 }
 0x230   : > { %1329 = vmatpush3.bf16.msra.mxu0 %v1500_v39 }
 0x231   : > { %1330 = vmatprep.subr.bf16.mxu0 %v1754_v32  ;;  %1349 = vmatpush3.bf16.msra.mxu1 %v1508_v45 }
 0x232   : > { %1350 = vmatprep.subr.bf16.mxu1 %v1754_v32 }
 0x234   : > { %1331 = vmatpush3.bf16.msra.mxu0 %v1501_v41 }
 0x235   : > { %1332 = vmatprep.subr.bf16.mxu0 %v1754_v32  ;;  %1351 = vmatpush3.bf16.msra.mxu1 %v1509_v48 }
 0x236   : > { %1352 = vmatprep.subr.bf16.mxu1 %v1754_v32 }
 0x238   : > { %1333 = vmatpush3.bf16.msra.mxu0 %v1502_v43 }
 0x239   : > { %1334 = vmatprep.subr.bf16.mxu0 %v1754_v32  ;;  %1353 = vmatpush3.bf16.msra.mxu1 %v1510_v50 }
 0x23a   : > { %1354 = vmatprep.subr.bf16.mxu1 %v1754_v32 }
 0x23c   : > { %1335 = vmatpush3.bf16.msra.mxu0 %v1503_v47 }
 0x23d   : > { %1355 = vmatpush3.bf16.msra.mxu1 %v1511_v51 }
 0x23f   : > { %1337 = vmatmul.mubr.bf16.vlgmr.msra.gmra.mxu0 %v696_v49 }
 0x2ff   : > { %v806_v53 = vpop.f32.mrf.mxu0 }
 0x300   : > { %v807_v54 = vadd.f32 %v1200_v52, %v806_v53 }
 0x301   : > { %v1338_v55 = vpop.f32.mrf.mxu0 }
 0x302   : > { %v812_v56 = vmax.f32 %v807_v54, 0.0 }
 0x303   : > { %v809_v57 = vpop.f32.mrf.mxu0 }
 0x304   : > { %v813_v58 = vpack.c.bf16 %v812_v56, %v812_v56 }
 0x305   : > { %v1339_v59 = vpop.f32.mrf.mxu0 }
 0x306   : > { %1357 = vmatmul.mubr.bf16.vlgmr.msra.gmra.mxu1 %v813_v58 }
 0x3c6   : > { %v922_v61 = vpop.f32.mrf.mxu1 }
 0x3c7   : > { %v923_v62 = vadd.f32 %v1210_v60, %v922_v61 }
 0x3c8   : > { %v1358_v63 = vpop.f32.mrf.mxu1  ;;  %933 = sbr.rel (%p1219_p1) target bundleno = 1205 (0x4b5), region = 96 }
 0x3c9   : > { %v928_v0 = vadd.f32 %v923_v62, %v694_v44 }
 0x3ca   : > { %v925_v1 = vpop.f32.mrf.mxu1 }
 0x3cb   : > { %929 = vst [vmem:[#allocation2] sm:$0xff] %v928_v0 }
 0x3cc   : > { %v1359_v2 = vpop.f32.mrf.mxu1 }
 0x3cd   : > { %v1512_v3 = vld [vmem:[#allocation12 + $0x38] sm:$0xff]   ;;  %v1756_v4 = vmov 0.0   ;;  %v1513_v5 = vld [vmem:[#allocation12 + $0x30] sm:$0xff]   ;;  %vm1757_vm2 = vmmov 0   ;;  %v1514_v6 = vld [vmem:[#allocation12 + $0x28] sm:$0xff]  }
 0x3ce   : > { %1360 = vmatprep.subr.bf16.mxu0 %v1756_v4  ;;  %1376 = vmatprep.mubr.msk.bf16.mxu0 %vm1757_vm2, %v1756_v4  ;;  %v1515_v7 = vld [vmem:[#allocation12 + $0x20] sm:$0xff]   ;;  %v1516_v8 = vld [vmem:[#allocation12 + $0x18] sm:$0xff]   ;;  %v1517_v9 = vld [vmem:[#allocation12 + $0x10] sm:$0xff]  }
 0x3cf   : > { %1361 = vmatpush3.bf16.msra.mxu0 %v1512_v3  ;;  %v1518_v10 = vld [vmem:[#allocation12 + $0x8] sm:$0xff]   ;;  %v1519_v13 = vld [vmem:[#allocation12] sm:$0xff]   ;;  %v1220_v15 = vld [vmem:[%s2015_s10] ss:$0 sm:$0xff] }
 0x3d0   : > { %1362 = vmatprep.subr.bf16.mxu0 %v1756_v4 }
 0x3d2   : > { %v934_v11 = vld [vmem:[#allocation2] sm:$0xff] }
 0x3d3   : > { %1363 = vmatpush3.bf16.msra.mxu0 %v1513_v5  ;;  %v935_v12 = vmax.f32 %v934_v11, 0.0 }
 0x3d4   : > { %1364 = vmatprep.subr.bf16.mxu0 %v1756_v4 }
 0x3d5   : > { %v936_v14 = vpack.c.bf16 %v935_v12, %v935_v12 }
 0x3d7   : > { %1365 = vmatpush3.bf16.msra.mxu0 %v1514_v6 }
 0x3d8   : > { %1366 = vmatprep.subr.bf16.mxu0 %v1756_v4 }
 0x3db   : > { %1367 = vmatpush3.bf16.msra.mxu0 %v1515_v7 }
 0x3dc   : > { %1368 = vmatprep.subr.bf16.mxu0 %v1756_v4 }
 0x3df   : > { %1369 = vmatpush3.bf16.msra.mxu0 %v1516_v8 }
 0x3e0   : > { %1370 = vmatprep.subr.bf16.mxu0 %v1756_v4 }
 0x3e3   : > { %1371 = vmatpush3.bf16.msra.mxu0 %v1517_v9 }
 0x3e4   : > { %1372 = vmatprep.subr.bf16.mxu0 %v1756_v4 }
 0x3e7   : > { %1373 = vmatpush3.bf16.msra.mxu0 %v1518_v10 }
 0x3e8   : > { %1374 = vmatprep.subr.bf16.mxu0 %v1756_v4 }
 0x3eb   : > { %1375 = vmatpush3.bf16.msra.mxu0 %v1519_v13 }
 0x3ee   : > { %1377 = vmatmul.mubr.bf16.vlgmr.msra.gmra.mxu0 %v936_v14 }
 0x4ae   : > { %v1042_v16 = vpop.f32.mrf.mxu0 }
 0x4af   : > { %v1043_v17 = vadd.f32 %v1220_v15, %v1042_v16 }
 0x4b0   : > { %v1378_v18 = vpop.f32.mrf.mxu0 }
 0x4b1   : > { %1048 = vst [vmem:[#allocation14] sm:$0xff] %v1043_v17 }
 0x4b2   : > { %v1045_v19 = vpop.f32.mrf.mxu0 }
 0x4b4   : > { %v1379_v20 = vpop.f32.mrf.mxu0 }
 0x4b5 PF: > { %s2027_s14 = sadd.s32 4294967295, %s1742_s19   ;;  %s1758_s24 = smov [#allocation14]  }
 0x4b6   : > { %p1981_p4 = scmp.eq.s32.totalorder %s2027_s14, 1  ;;  %s1058_s27 = sshll.u32 %s1758_s24, 4  ;;  %s1059_s27 = int_to_ptr.vmem [resolvable:$true] %s1058_s27 }
 0x4b7   : > { %s1676_s29 = scalar_lea.vmem %s1059_s27, 128  ;;  %p1683_p10 = scmp.lt.s32.totalorder %s1059_s27, %s1059_s27 }
 0x4b8   : > { %p1677_p7 = scmp.ne.s32.totalorder %s1059_s27, %s1676_s29  ;;  %p1684_p11 = scmp.lt.s32.totalorder %s1676_s29, %s1676_s29 }
 0x4ba   : > { %p1678_p8 = pnand %p1677_p7, %p1981_p4  ;;  %p1685_p12 = por %p1684_p11, %p1683_p10 }
 0x4bc   : > { %p1679_p9 = pneg %p1678_p8 }
 0x4be   : > { %p1686_p13 = pnand %p1685_p12, %p1679_p9 }
 0x4c0   : > { %1689 = shalt.err (!%p1686_p13)
}
 0x4c1   : > { %1405 = dma.vmem_to_hbm [thread:$0]  (%p1981_p4), %s1059_s27, 128, %s2016_s11, [#allocation5]  }
 0x4c2   : > { %1729 = dma.done.wait (%p1981_p4), [#allocation5], 128  }
 0x4c3   : > { %1731 = vsyncadd (%p1981_p4), [#allocation5], 4294967168 }
 0x4c4 PF: > { %s26_s19 = sadd.s32 1, %s1742_s19   ;;  %s2029_s17 = smov %s1738_s18 }
 0x4c5   : > { %p23_p0 = scmp.ge.s32.totalorder %s26_s19, 4   ;;  %s2030_s18 = smov %s2032_s28 }
 0x4c7   :  { %25 = sbr.rel (!%p23_p0) target bundleno = 6 (0x6), region = 127 }
 0x4cc   :  { %1071 = vsyncpa [#allocation4], 1 }
 0x4cd   :  { %1073 = vsyncpa [#allocation4 + $0x1], 1 }
 0x4ce   :  { %1074 = vsyncpa [#allocation7], 1 }
 0x4cf   :  { %1075 = vsyncpa [#allocation10], 1 }
 0x4d0   :  { %1076 = vsyncpa [#allocation13], 1 }
 0x4d1   :  { %1077 = vsyncpa [#allocation5], 1 }
 0x4d2   :  { %1079 = vsyncpa [#allocation5 + $0x1], 1 }

// kernel: tpu_custom_call.1
= control target key start
LH: loop header
LB: loop body
LE: loop exit
PB: predicated region body
PF: predicated region fallthrough
CT: control target
= control target key end

     0   :  { %16 = vsyncpa [#allocation4], 0  ;;  %s2005_s0 = inlined_call_operand.hbm [shape: bf16[8,128], index: 0, kind: input, shape index: {}]   ;;  %s2006_s1 = inlined_call_operand.hbm [shape: bf16[128,128], index: 1, kind: input, shape index: {}]   ;;  %s2007_s2 = inlined_call_operand.vmem [shape: f32[1,128], index: 2, kind: input, shape index: {}]   ;;  %s2008_s3 = inlined_call_operand.hbm [shape: bf16[128,128], index: 3, kind: input, shape index: {}]   ;;  %s2009_s4 = inlined_call_operand.vmem [shape: f32[1,128], index: 4, kind: input, shape index: {}]   ;;  %s2010_s5 = inlined_call_operand.hbm [shape: bf16[2,128,128], index: 5, kind: input, shape index: {}]   ;;  %s2011_s6 = inlined_call_operand.vmem [shape: f32[2,1,128], index: 6, kind: input, shape index: {}]   ;;  %s2012_s7 = inlined_call_operand.hbm [shape: bf16[2,128,128], index: 7, kind: input, shape index: {}]   ;;  %s2013_s8 = inlined_call_operand.vmem [shape: f32[2,1,128], index: 8, kind: input, shape index: {}]   ;;  %s2014_s9 = inlined_call_operand.hbm [shape: bf16[128,128], index: 9, kind: input, shape index: {}]   ;;  %s2015_s10 = inlined_call_operand.vmem [shape: f32[1,128], index: 10, kind: input, shape index: {}]   ;;  %s2016_s11 = inlined_call_operand.hbm [shape: f32[8,128], index: 11, kind: output, shape index: {}]  }
   0x1   :  { %17 = vsyncpa [#allocation7], 0 }
   0x2   :  { %18 = vsyncpa [#allocation10], 0 }
   0x3   :  { %19 = vsyncpa [#allocation13], 0 }
   0x4   :  { %20 = vsyncpa [#allocation5], 0  ;;  %s1819_s17 = smov 0   ;;  %s1821_s18 = smov 0  }
   0x5   :  { %s1823_s19 = smov 0  }
   0x6 LB: > { %s1744_s20 = smov [#allocation6]   ;;  %s2020_s22 = sadd.s32 4294967295, %s1742_s19   ;;  %s1742_s19 = sphi %s1823_s19, %s26_s19   ;;  %s1738_s18 = sphi %s1821_s18, %s2030_s18   ;;  %s1734_s17 = sphi %s1819_s17, %s2029_s17  }
   0x7   : > { %s330_s21 = sshll.u32 %s1744_s20, 4  ;;  %p1165_p0 = scmp.ge.s32.totalorder %s1742_s19, 1  ;;  %s331_s21 = int_to_ptr.vmem [resolvable:$true] %s330_s21 }
   0x8   : > { %p305_p1 = scmp.lt.s32.totalorder %s1742_s19, 3  ;;  %p1839_p2 = scmp.eq.s32.totalorder %s2020_s22, 0 }
   0x9   : > { %s1745_s25 = smov [#allocation9]   ;;  %s35_s28 = sadd.s32 1, %s1738_s18 }
   0xa   : > { %s2021_s23 = scalar_select %p1839_p2, 1, 0 }
   0xb   : > { %p1843_p3 = pnand %p1165_p0, %p305_p1  ;;  %s362_s26 = sshll.u32 %s1745_s25, 4  ;;  %s363_s26 = int_to_ptr.vmem [resolvable:$true] %s362_s26 }
   0xc   : > { %s1531_s30 = scalar_lea.vmem %s331_s21, 1024  ;;  %p1539_p10 = scmp.lt.s32.totalorder %s331_s21, %s331_s21 }
   0xd   : > { %s2022_s24 = scalar_select %p1843_p3, 1, 0 }
   0xe   : > { %p1408_p4 = pneg %p1843_p3  ;;  %p1532_p7 = scmp.ne.s32.totalorder %s331_s21, %s1531_s30 }
   0xf   : > { %p1540_p11 = scmp.lt.s32.totalorder %s1531_s30, %s1531_s30 }
  0x10   : > { %p1851_p5 = pnand %p1839_p2, %p1408_p4 }
  0x11   : > { %p1541_p12 = por %p1540_p11, %p1539_p10 }
  0x12   : > { %p1858_p6 = pneg %p1851_p5 }
  0x14   : > { %p1534_p8 = pnand %p1532_p7, %p1858_p6 }
  0x16   : > { %p1535_p9 = pneg %p1534_p8 }
  0x18   : > { %p1542_p13 = pnand %p1541_p12, %p1535_p9 }
  0x1a   : > { %1545 = shalt.err (!%p1542_p13)
}
  0x1b   : > { %s1746_s12 = smov 64   ;;  %s1747_s13 = smov 4  }
  0x1c   : > { %1414 = dma.hbm_to_vmem [thread:$0]  (!%p1851_p5), %s2006_s1, 1024, %s331_s21, [#allocation7], %s1746_s12, %s1746_s12, %s1747_s13  }
  0x1d   : > { %s1557_s16 = scalar_lea.vmem %s363_s26, 2048  ;;  %p1565_p7 = scmp.lt.s32.totalorder %s363_s26, %s363_s26 }
  0x1e   : > { %p1558_p0 = scmp.ne.s32.totalorder %s363_s26, %s1557_s16  ;;  %p1566_p8 = scmp.lt.s32.totalorder %s1557_s16, %s1557_s16 }
  0x20   : > { %p1560_p1 = pnand %p1558_p0, %p1858_p6  ;;  %p1567_p9 = por %p1566_p8, %p1565_p7 }
  0x22   : > { %p1561_p4 = pneg %p1560_p1 }
  0x24   : > { %p1568_p10 = pnand %p1567_p9, %p1561_p4 }
  0x26   : > { %1571 = shalt.err (!%p1568_p10)
}
  0x27   : > { %1420 = dma.hbm_to_vmem [thread:$0]  (!%p1851_p5), %s2010_s5, 2048, %s363_s26, [#allocation10], %s1746_s12, %s1746_s12, %s1747_s13  }
  0x28   : > { %p36_p11 = scmp.ge.s32.totalorder %s35_s28, 2  ;;  %s1748_s21 = smov [#allocation3]  }
  0x29   : > { %s320_s30 = sshll.u32 %s1748_s21, 4  ;;  %s1749_s14 = smov [#allocation8]   ;;  %s321_s30 = int_to_ptr.vmem [resolvable:$true] %s320_s30 }
  0x2a   : > { %s2032_s28 = smov (%p36_p11, %s35_s28), 0  ;;  %s346_s15 = sshll.u32 %s1749_s14, 4  ;;  %s347_s15 = int_to_ptr.vmem [resolvable:$true] %s346_s15 }
  0x2b   : > { %s1583_s16 = scalar_lea.vmem %s321_s30, 64  ;;  %p1591_p1 = scmp.lt.s32.totalorder %s321_s30, %s321_s30 }
  0x2c   : > { %p1584_p12 = scmp.ne.s32.totalorder %s321_s30, %s1583_s16  ;;  %p1592_p4 = scmp.lt.s32.totalorder %s1583_s16, %s1583_s16 }
  0x2e   : > { %p1586_p13 = pnand %p1584_p12, %p1858_p6  ;;  %p1593_p7 = por %p1592_p4, %p1591_p1 }
  0x30   : > { %p1587_p0 = pneg %p1586_p13 }
  0x32   : > { %p1594_p8 = pnand %p1593_p7, %p1587_p0 }
  0x34   : > { %1597 = shalt.err (!%p1594_p8)
}
  0x35   : > { %1411 = dma.hbm_to_vmem [thread:$0]  (!%p1851_p5), %s2005_s0, 64, %s321_s30, [#allocation4]  }
  0x36   : > { %s1609_s25 = scalar_lea.vmem %s347_s15, 1024  ;;  %p1617_p12 = scmp.lt.s32.totalorder %s347_s15, %s347_s15 }
  0x37   : > { %p1610_p9 = scmp.ne.s32.totalorder %s347_s15, %s1609_s25  ;;  %p1618_p13 = scmp.lt.s32.totalorder %s1609_s25, %s1609_s25 }
  0x39   : > { %p1612_p10 = pnand %p1610_p9, %p1858_p6  ;;  %p1619_p2 = por %p1618_p13, %p1617_p12 }
  0x3b   : > { %p1613_p11 = pneg %p1612_p10 }
  0x3d   : > { %p1620_p3 = pnand %p1619_p2, %p1613_p11 }
  0x3f   : > { %1623 = shalt.err (!%p1620_p3)
}
  0x40   : > { %1417 = dma.hbm_to_vmem [thread:$0]  (!%p1851_p5), %s2008_s3, 1024, %s347_s15, [#allocation7], %s1746_s12, %s1746_s12, %s1747_s13  }
  0x41   : > { %s1750_s30 = smov [#allocation11]   ;;  %s1751_s26 = smov [#allocation12]  }
  0x42   : > { %s378_s16 = sshll.u32 %s1750_s30, 4  ;;  %s394_s20 = sshll.u32 %s1751_s26, 4  ;;  %s379_s16 = int_to_ptr.vmem [resolvable:$true] %s378_s16  ;;  %s395_s20 = int_to_ptr.vmem [resolvable:$true] %s394_s20 }
  0x43   : > { %s1635_s22 = scalar_lea.vmem %s379_s16, 2048  ;;  %p1643_p1 = scmp.lt.s32.totalorder %s379_s16, %s379_s16 }
  0x44   : > { %p1636_p0 = scmp.ne.s32.totalorder %s379_s16, %s1635_s22  ;;  %p1644_p4 = scmp.lt.s32.totalorder %s1635_s22, %s1635_s22 }
  0x46   : > { %p1638_p2 = pnand %p1636_p0, %p1858_p6  ;;  %p1645_p7 = por %p1644_p4, %p1643_p1 }
  0x48   : > { %p1639_p3 = pneg %p1638_p2 }
  0x4a   : > { %p1646_p8 = pnand %p1645_p7, %p1639_p3 }
  0x4c   : > { %1649 = shalt.err (!%p1646_p8)
}
  0x4d   : > { %1423 = dma.hbm_to_vmem [thread:$0]  (!%p1851_p5), %s2012_s7, 2048, %s379_s16, [#allocation10], %s1746_s12, %s1746_s12, %s1747_s13  }
  0x4e   : > { %s1661_s21 = scalar_lea.vmem %s395_s20, 1024  ;;  %p1669_p12 = scmp.lt.s32.totalorder %s395_s20, %s395_s20 }
  0x4f   : > { %p1662_p9 = scmp.ne.s32.totalorder %s395_s20, %s1661_s21  ;;  %p1670_p13 = scmp.lt.s32.totalorder %s1661_s21, %s1661_s21 }
  0x51   : > { %p1664_p10 = pnand %p1662_p9, %p1858_p6  ;;  %p1671_p0 = por %p1670_p13, %p1669_p12 }
  0x53   : > { %p1665_p11 = pneg %p1664_p10 }
  0x55   : > { %p1672_p2 = pnand %p1671_p0, %p1665_p11 }
  0x57   : > { %1675 = shalt.err (!%p1672_p2)
}
  0x58   : > { %1426 = dma.hbm_to_vmem [thread:$0]  (!%p1851_p5), %s2014_s9, 1024, %s395_s20, [#allocation13], %s1746_s12, %s1746_s12, %s1747_s13  }
  0x59   : > { %p2025_p3 = scmp.ne.s32.totalorder %s2022_s24, 0 }
  0x5a   : > { %p2026_p6 = scmp.ne.s32.totalorder (!%p2025_p3), %s2021_s23, 0 }
  0x5b   : > { %413 = sbr.rel (%p2025_p3) target bundleno = 1220 (0x4c4), region = 64 }
  0x60   : > { %1713 = dma.done.wait (%p2026_p6), [#allocation4], 64  }
  0x61   : > { %1715 = vsyncadd (%p2026_p6), [#allocation4], 4294967232 }
  0x62   : > { %1717 = dma.done.wait (%p2026_p6), [#allocation7], 2048  }
  0x63   : > { %1719 = vsyncadd (%p2026_p6), [#allocation7], 4294965248 }
  0x64   : > { %1721 = dma.done.wait (%p2026_p6), [#allocation10], 4096  }
  0x65   : > { %1723 = vsyncadd (%p2026_p6), [#allocation10], 4294963200 }
  0x66   : > { %1725 = dma.done.wait (%p2026_p6), [#allocation13], 1024  }
  0x67   : > { %1727 = vsyncadd (%p2026_p6), [#allocation13], 4294966272  ;;  %p1179_p5 = scmp.ne.s32.totalorder %s1734_s17, 0 }
  0x69   : > { %467 = sbr.rel (%p1179_p5) target bundleno = 541 (0x21d), region = 92 }
  0x6e   : > { %v1480_v0 = vld [vmem:[#allocation6 + $0x38] sm:$0xff]   ;;  %v1752_v1 = vmov 0.0   ;;  %v1481_v2 = vld [vmem:[#allocation6 + $0x30] sm:$0xff]   ;;  %vm1753_vm0 = vmmov 0   ;;  %v1482_v3 = vld [vmem:[#allocation6 + $0x28] sm:$0xff]  }
  0x6f   : > { %1280 = vmatprep.subr.bf16.mxu0 %v1752_v1  ;;  %1300 = vmatprep.subr.bf16.mxu1 %v1752_v1  ;;  %v1488_v4 = vld [vmem:[#allocation8 + $0x38] sm:$0xff]   ;;  %v1483_v5 = vld [vmem:[#allocation6 + $0x20] sm:$0xff]   ;;  %v1489_v6 = vld [vmem:[#allocation8 + $0x30] sm:$0xff]  }
  0x70   : > { %1281 = vmatpush3.bf16.msra.mxu0 %v1480_v0  ;;  %1296 = vmatprep.mubr.msk.bf16.mxu0 %vm1753_vm0, %v1752_v1  ;;  %v1484_v7 = vld [vmem:[#allocation6 + $0x18] sm:$0xff]   ;;  %v1490_v8 = vld [vmem:[#allocation8 + $0x28] sm:$0xff]   ;;  %v1485_v9 = vld [vmem:[#allocation6 + $0x10] sm:$0xff]  }
  0x71   : > { %1282 = vmatprep.subr.bf16.mxu0 %v1752_v1  ;;  %1316 = vmatprep.mubr.msk.bf16.mxu1 %vm1753_vm0, %v1752_v1  ;;  %v1491_v10 = vld [vmem:[#allocation8 + $0x20] sm:$0xff]   ;;  %v1486_v11 = vld [vmem:[#allocation6 + $0x8] sm:$0xff]   ;;  %v1492_v12 = vld [vmem:[#allocation8 + $0x18] sm:$0xff]  }
  0x72   : > { %1301 = vmatpush3.bf16.msra.mxu1 %v1488_v4  ;;  %v1487_v13 = vld [vmem:[#allocation6] sm:$0xff]   ;;  %v1493_v14 = vld [vmem:[#allocation8 + $0x10] sm:$0xff]   ;;  %v468_v15 = vld [vmem:[#allocation3] sm:$0xf] }
  0x73   : > { %1302 = vmatprep.subr.bf16.mxu1 %v1752_v1  ;;  %v1494_v16 = vld [vmem:[#allocation8 + $0x8] sm:$0xff]   ;;  %v1495_v17 = vld [vmem:[#allocation8] sm:$0xff]   ;;  %v1180_v18 = vld [vmem:[%s2007_s2] ss:$0 sm:$0xff] }
  0x74   : > { %1283 = vmatpush3.bf16.msra.mxu0 %v1481_v2  ;;  %v1189_v26 = vld [vmem:[%s2009_s4] ss:$0 sm:$0xff] }
  0x75   : > { %1284 = vmatprep.subr.bf16.mxu0 %v1752_v1 }
  0x76   : > { %1303 = vmatpush3.bf16.msra.mxu1 %v1489_v6 }
  0x77   : > { %1304 = vmatprep.subr.bf16.mxu1 %v1752_v1 }
  0x78   : > { %1285 = vmatpush3.bf16.msra.mxu0 %v1482_v3 }
  0x79   : > { %1286 = vmatprep.subr.bf16.mxu0 %v1752_v1 }
  0x7a   : > { %1305 = vmatpush3.bf16.msra.mxu1 %v1490_v8 }
  0x7b   : > { %1306 = vmatprep.subr.bf16.mxu1 %v1752_v1 }
  0x7c   : > { %1287 = vmatpush3.bf16.msra.mxu0 %v1483_v5 }
  0x7d   : > { %1288 = vmatprep.subr.bf16.mxu0 %v1752_v1 }
  0x7e   : > { %1307 = vmatpush3.bf16.msra.mxu1 %v1491_v10 }
  0x7f   : > { %1308 = vmatprep.subr.bf16.mxu1 %v1752_v1 }
  0x80   : > { %1289 = vmatpush3.bf16.msra.mxu0 %v1484_v7 }
  0x81   : > { %1290 = vmatprep.subr.bf16.mxu0 %v1752_v1 }
  0x82   : > { %1309 = vmatpush3.bf16.msra.mxu1 %v1492_v12 }
  0x83   : > { %1310 = vmatprep.subr.bf16.mxu1 %v1752_v1 }
  0x84   : > { %1291 = vmatpush3.bf16.msra.mxu0 %v1485_v9 }
  0x85   : > { %1292 = vmatprep.subr.bf16.mxu0 %v1752_v1 }
  0x86   : > { %1311 = vmatpush3.bf16.msra.mxu1 %v1493_v14 }
  0x87   : > { %1312 = vmatprep.subr.bf16.mxu1 %v1752_v1 }
  0x88   : > { %1293 = vmatpush3.bf16.msra.mxu0 %v1486_v11 }
  0x89   : > { %1294 = vmatprep.subr.bf16.mxu0 %v1752_v1 }
  0x8a   : > { %1313 = vmatpush3.bf16.msra.mxu1 %v1494_v16 }
  0x8b   : > { %1314 = vmatprep.subr.bf16.mxu1 %v1752_v1 }
  0x8c   : > { %1295 = vmatpush3.bf16.msra.mxu0 %v1487_v13 }
  0x8e   : > { %1315 = vmatpush3.bf16.msra.mxu1 %v1495_v17 }
  0x8f   : > { %1297 = vmatmul.mubr.bf16.vlgmr.msra.gmra.mxu0 %v468_v15 }
 0x14f   : > { %v574_v19 = vpop.f32.mrf.mxu0 }
 0x150   : > { %v575_v20 = vadd.f32 %v1180_v18, %v574_v19 }
 0x151   : > { %v1298_v21 = vpop.f32.mrf.mxu0 }
 0x152   : > { %v580_v22 = vmax.f32 %v575_v20, 0.0 }
 0x153   : > { %v577_v23 = vpop.f32.mrf.mxu0 }
 0x154   : > { %v581_v24 = vpack.c.bf16 %v580_v22, %v580_v22 }
 0x155   : > { %v1299_v25 = vpop.f32.mrf.mxu0 }
 0x156   : > { %1317 = vmatmul.mubr.bf16.vlgmr.msra.gmra.mxu1 %v581_v24 }
 0x216   : > { %v687_v27 = vpop.f32.mrf.mxu1 }
 0x217   : > { %v688_v28 = vadd.f32 %v1189_v26, %v687_v27 }
 0x218   : > { %v1318_v29 = vpop.f32.mrf.mxu1 }
 0x219   : > { %693 = vst [vmem:[#allocation2] sm:$0xff] %v688_v28 }
 0x21a   : > { %v690_v30 = vpop.f32.mrf.mxu1 }
 0x21c   : > { %v1319_v31 = vpop.f32.mrf.mxu1 }
 0x21d PF: > { %s1233_s12 = sshll.u32 %s1734_s17, 6  ;;  %v1754_v32 = vmov 0.0   ;;  %vm1755_vm1 = vmmov 0   ;;  %s716_s20 = scalar_lea.vmem %s2011_s6, %s1734_s17 }
 0x21e   : > { %1320 = vmatprep.subr.bf16.mxu0 %v1754_v32  ;;  %1336 = vmatprep.mubr.msk.bf16.mxu0 %vm1755_vm1, %v1754_v32  ;;  %s1947_s13 = scalar_lea.vmem [#allocation9], %s1233_s12  ;;  %s1952_s30 = scalar_lea.vmem [#allocation11], %s1233_s12  ;;  %v1200_v52 = vld [vmem:[%s716_s20] ss:$0 sm:$0xff] }
 0x21f   : > { %v1496_v33 = vld [vmem:[%s1947_s13 + $0x38] sm:$0xff]   ;;  %1340 = vmatprep.subr.bf16.mxu1 %v1754_v32  ;;  %1356 = vmatprep.mubr.msk.bf16.mxu1 %vm1755_vm1, %v1754_v32  ;;  %v1497_v34 = vld [vmem:[%s1947_s13 + $0x30] sm:$0xff]   ;;  %v1498_v35 = vld [vmem:[%s1947_s13 + $0x28] sm:$0xff]   ;;  %s832_s21 = scalar_lea.vmem %s2013_s8, %s1734_s17  ;;  %p1219_p1 = scmp.ne.s32.totalorder %s1734_s17, 1 }
 0x220   : > { %1321 = vmatpush3.bf16.msra.mxu0 %v1496_v33  ;;  %v1504_v36 = vld [vmem:[%s1952_s30 + $0x38] sm:$0xff]   ;;  %v1499_v37 = vld [vmem:[%s1947_s13 + $0x20] sm:$0xff]   ;;  %v1505_v38 = vld [vmem:[%s1952_s30 + $0x30] sm:$0xff]  }
 0x221   : > { %1322 = vmatprep.subr.bf16.mxu0 %v1754_v32  ;;  %1341 = vmatpush3.bf16.msra.mxu1 %v1504_v36  ;;  %v1500_v39 = vld [vmem:[%s1947_s13 + $0x18] sm:$0xff]   ;;  %v1506_v40 = vld [vmem:[%s1952_s30 + $0x28] sm:$0xff]   ;;  %v1501_v41 = vld [vmem:[%s1947_s13 + $0x10] sm:$0xff]  }
 0x222   : > { %1342 = vmatprep.subr.bf16.mxu1 %v1754_v32  ;;  %v1507_v42 = vld [vmem:[%s1952_s30 + $0x20] sm:$0xff]   ;;  %v1502_v43 = vld [vmem:[%s1947_s13 + $0x8] sm:$0xff]   ;;  %v1508_v45 = vld [vmem:[%s1952_s30 + $0x18] sm:$0xff]  }
 0x223   : > { %v694_v44 = vld [vmem:[#allocation2] sm:$0xff]  ;;  %v1509_v48 = vld [vmem:[%s1952_s30 + $0x10] sm:$0xff]   ;;  %v1510_v50 = vld [vmem:[%s1952_s30 + $0x8] sm:$0xff]  }
 0x224   : > { %1323 = vmatpush3.bf16.msra.mxu0 %v1497_v34  ;;  %v695_v46 = vmax.f32 %v694_v44, 0.0  ;;  %v1503_v47 = vld [vmem:[%s1947_s13] sm:$0xff]  }
 0x225   : > { %1324 = vmatprep.subr.bf16.mxu0 %v1754_v32  ;;  %1343 = vmatpush3.bf16.msra.mxu1 %v1505_v38  ;;  %v1511_v51 = vld [vmem:[%s1952_s30] sm:$0xff]  }
 0x226   : > { %1344 = vmatprep.subr.bf16.mxu1 %v1754_v32  ;;  %v696_v49 = vpack.c.bf16 %v695_v46, %v695_v46  ;;  %v1210_v60 = vld [vmem:[%s832_s21] ss:$0 sm:$0xff] }
 0x228   : > { %1325 = vmatpush3.bf16.msra.mxu0 %v1498_v35 }
 0x229   : > { %1326 = vmatprep.subr.bf16.mxu0 %v1754_v32  ;;  %1345 = vmatpush3.bf16.msra.mxu1 %v1506_v40 }
 0x22a   : > { %1346 = vmatprep.subr.bf16.mxu1 %v1754_v32 }
 0x22c   : > { %1327 = vmatpush3.bf16.msra.mxu0 %v1499_v37 }
 0x22d   : > { %1328 = vmatprep.subr.bf16.mxu0 %v1754_v32  ;;  %1347 = vmatpush3.bf16.msra.mxu1 %v1507_v42 }
 0x22e   : > { %1348 = vmatprep.subr.bf16.mxu1 %v1754_v32 }
 0x230   : > { %1329 = vmatpush3.bf16.msra.mxu0 %v1500_v39 }
 0x231   : > { %1330 = vmatprep.subr.bf16.mxu0 %v1754_v32  ;;  %1349 = vmatpush3.bf16.msra.mxu1 %v1508_v45 }
 0x232   : > { %1350 = vmatprep.subr.bf16.mxu1 %v1754_v32 }
 0x234   : > { %1331 = vmatpush3.bf16.msra.mxu0 %v1501_v41 }
 0x235   : > { %1332 = vmatprep.subr.bf16.mxu0 %v1754_v32  ;;  %1351 = vmatpush3.bf16.msra.mxu1 %v1509_v48 }
 0x236   : > { %1352 = vmatprep.subr.bf16.mxu1 %v1754_v32 }
 0x238   : > { %1333 = vmatpush3.bf16.msra.mxu0 %v1502_v43 }
 0x239   : > { %1334 = vmatprep.subr.bf16.mxu0 %v1754_v32  ;;  %1353 = vmatpush3.bf16.msra.mxu1 %v1510_v50 }
 0x23a   : > { %1354 = vmatprep.subr.bf16.mxu1 %v1754_v32 }
 0x23c   : > { %1335 = vmatpush3.bf16.msra.mxu0 %v1503_v47 }
 0x23d   : > { %1355 = vmatpush3.bf16.msra.mxu1 %v1511_v51 }
 0x23f   : > { %1337 = vmatmul.mubr.bf16.vlgmr.msra.gmra.mxu0 %v696_v49 }
 0x2ff   : > { %v806_v53 = vpop.f32.mrf.mxu0 }
 0x300   : > { %v807_v54 = vadd.f32 %v1200_v52, %v806_v53 }
 0x301   : > { %v1338_v55 = vpop.f32.mrf.mxu0 }
 0x302   : > { %v812_v56 = vmax.f32 %v807_v54, 0.0 }
 0x303   : > { %v809_v57 = vpop.f32.mrf.mxu0 }
 0x304   : > { %v813_v58 = vpack.c.bf16 %v812_v56, %v812_v56 }
 0x305   : > { %v1339_v59 = vpop.f32.mrf.mxu0 }
 0x306   : > { %1357 = vmatmul.mubr.bf16.vlgmr.msra.gmra.mxu1 %v813_v58 }
 0x3c6   : > { %v922_v61 = vpop.f32.mrf.mxu1 }
 0x3c7   : > { %v923_v62 = vadd.f32 %v1210_v60, %v922_v61 }
 0x3c8   : > { %v1358_v63 = vpop.f32.mrf.mxu1  ;;  %933 = sbr.rel (%p1219_p1) target bundleno = 1205 (0x4b5), region = 96 }
 0x3c9   : > { %v928_v0 = vadd.f32 %v923_v62, %v694_v44 }
 0x3ca   : > { %v925_v1 = vpop.f32.mrf.mxu1 }
 0x3cb   : > { %929 = vst [vmem:[#allocation2] sm:$0xff] %v928_v0 }
 0x3cc   : > { %v1359_v2 = vpop.f32.mrf.mxu1 }
 0x3cd   : > { %v1512_v3 = vld [vmem:[#allocation12 + $0x38] sm:$0xff]   ;;  %v1756_v4 = vmov 0.0   ;;  %v1513_v5 = vld [vmem:[#allocation12 + $0x30] sm:$0xff]   ;;  %vm1757_vm2 = vmmov 0   ;;  %v1514_v6 = vld [vmem:[#allocation12 + $0x28] sm:$0xff]  }
 0x3ce   : > { %1360 = vmatprep.subr.bf16.mxu0 %v1756_v4  ;;  %1376 = vmatprep.mubr.msk.bf16.mxu0 %vm1757_vm2, %v1756_v4  ;;  %v1515_v7 = vld [vmem:[#allocation12 + $0x20] sm:$0xff]   ;;  %v1516_v8 = vld [vmem:[#allocation12 + $0x18] sm:$0xff]   ;;  %v1517_v9 = vld [vmem:[#allocation12 + $0x10] sm:$0xff]  }
 0x3cf   : > { %1361 = vmatpush3.bf16.msra.mxu0 %v1512_v3  ;;  %v1518_v10 = vld [vmem:[#allocation12 + $0x8] sm:$0xff]   ;;  %v1519_v13 = vld [vmem:[#allocation12] sm:$0xff]   ;;  %v1220_v15 = vld [vmem:[%s2015_s10] ss:$0 sm:$0xff] }
 0x3d0   : > { %1362 = vmatprep.subr.bf16.mxu0 %v1756_v4 }
 0x3d2   : > { %v934_v11 = vld [vmem:[#allocation2] sm:$0xff] }
 0x3d3   : > { %1363 = vmatpush3.bf16.msra.mxu0 %v1513_v5  ;;  %v935_v12 = vmax.f32 %v934_v11, 0.0 }
 0x3d4   : > { %1364 = vmatprep.subr.bf16.mxu0 %v1756_v4 }
 0x3d5   : > { %v936_v14 = vpack.c.bf16 %v935_v12, %v935_v12 }
 0x3d7   : > { %1365 = vmatpush3.bf16.msra.mxu0 %v1514_v6 }
 0x3d8   : > { %1366 = vmatprep.subr.bf16.mxu0 %v1756_v4 }
 0x3db   : > { %1367 = vmatpush3.bf16.msra.mxu0 %v1515_v7 }
 0x3dc   : > { %1368 = vmatprep.subr.bf16.mxu0 %v1756_v4 }
 0x3df   : > { %1369 = vmatpush3.bf16.msra.mxu0 %v1516_v8 }
 0x3e0   : > { %1370 = vmatprep.subr.bf16.mxu0 %v1756_v4 }
 0x3e3   : > { %1371 = vmatpush3.bf16.msra.mxu0 %v1517_v9 }
 0x3e4   : > { %1372 = vmatprep.subr.bf16.mxu0 %v1756_v4 }
 0x3e7   : > { %1373 = vmatpush3.bf16.msra.mxu0 %v1518_v10 }
 0x3e8   : > { %1374 = vmatprep.subr.bf16.mxu0 %v1756_v4 }
 0x3eb   : > { %1375 = vmatpush3.bf16.msra.mxu0 %v1519_v13 }
 0x3ee   : > { %1377 = vmatmul.mubr.bf16.vlgmr.msra.gmra.mxu0 %v936_v14 }
 0x4ae   : > { %v1042_v16 = vpop.f32.mrf.mxu0 }
 0x4af   : > { %v1043_v17 = vadd.f32 %v1220_v15, %v1042_v16 }
 0x4b0   : > { %v1378_v18 = vpop.f32.mrf.mxu0 }
 0x4b1   : > { %1048 = vst [vmem:[#allocation14] sm:$0xff] %v1043_v17 }
 0x4b2   : > { %v1045_v19 = vpop.f32.mrf.mxu0 }
 0x4b4   : > { %v1379_v20 = vpop.f32.mrf.mxu0 }
 0x4b5 PF: > { %s2027_s14 = sadd.s32 4294967295, %s1742_s19   ;;  %s1758_s24 = smov [#allocation14]  }
 0x4b6   : > { %p1981_p4 = scmp.eq.s32.totalorder %s2027_s14, 1  ;;  %s1058_s27 = sshll.u32 %s1758_s24, 4  ;;  %s1059_s27 = int_to_ptr.vmem [resolvable:$true] %s1058_s27 }
 0x4b7   : > { %s1676_s29 = scalar_lea.vmem %s1059_s27, 128  ;;  %p1683_p10 = scmp.lt.s32.totalorder %s1059_s27, %s1059_s27 }
 0x4b8   : > { %p1677_p7 = scmp.ne.s32.totalorder %s1059_s27, %s1676_s29  ;;  %p1684_p11 = scmp.lt.s32.totalorder %s1676_s29, %s1676_s29 }
 0x4ba   : > { %p1678_p8 = pnand %p1677_p7, %p1981_p4  ;;  %p1685_p12 = por %p1684_p11, %p1683_p10 }
 0x4bc   : > { %p1679_p9 = pneg %p1678_p8 }
 0x4be   : > { %p1686_p13 = pnand %p1685_p12, %p1679_p9 }
 0x4c0   : > { %1689 = shalt.err (!%p1686_p13)
}
 0x4c1   : > { %1405 = dma.vmem_to_hbm [thread:$0]  (%p1981_p4), %s1059_s27, 128, %s2016_s11, [#allocation5]  }
 0x4c2   : > { %1729 = dma.done.wait (%p1981_p4), [#allocation5], 128  }
 0x4c3   : > { %1731 = vsyncadd (%p1981_p4), [#allocation5], 4294967168 }
 0x4c4 PF: > { %s26_s19 = sadd.s32 1, %s1742_s19   ;;  %s2029_s17 = smov %s1738_s18 }
 0x4c5   : > { %p23_p0 = scmp.ge.s32.totalorder %s26_s19, 4   ;;  %s2030_s18 = smov %s2032_s28 }
 0x4c7   :  { %25 = sbr.rel (!%p23_p0) target bundleno = 6 (0x6), region = 127 }
 0x4cc   :  { %1071 = vsyncpa [#allocation4], 1 }
 0x4cd   :  { %1073 = vsyncpa [#allocation4 + $0x1], 1 }
 0x4ce   :  { %1074 = vsyncpa [#allocation7], 1 }
 0x4cf   :  { %1075 = vsyncpa [#allocation10], 1 }
 0x4d0   :  { %1076 = vsyncpa [#allocation13], 1 }
 0x4d1   :  { %1077 = vsyncpa [#allocation5], 1 }
 0x4d2   :  { %1079 = vsyncpa [#allocation5 + $0x1], 1 }

</bundles_post_ra>
